<compile_context>
chip_gen: v7x
topology: tpu7x:2x2x1
jax: 0.10.0
libtpu: 0.0.40
codegen_flags: <defaults>
</compile_context>

<pallas_src>
import jax
import jax.numpy as jnp
from jax.experimental import pallas as pl
from jax.experimental.pallas import tpu as pltpu


# ---- packed-parameter layout (all offsets static) -------------------------
# weights stored as (in, out), row-major;  w[k, j] lives at OFF_W + k*n_out + j
OFF_W1, OFF_B1 = 0, 8          # (1,8), (8,)
OFF_W2, OFF_B2 = 16, 48        # (8,4), (4,)
OFF_W3, OFF_B3 = 52, 84        # (4,8), (8,)
OFF_W4, OFF_B4 = 92, 124       # (8,4), (4,)
OFF_W5, OFF_B5 = 128, 132      # (4,1), (1,)
N_PARAMS = 133

LANE = 128
BLOCK_ROWS = 8                 # 8 sublanes x 128 lanes = 1024 batch elems / step


def mlp_kernel(p_ref, x_ref, o_ref):
    """p_ref: (133,) f32 in SMEM.  x_ref/o_ref: (BLOCK_ROWS, 128) f32 in VMEM.

    Batch elements occupy lanes+sublanes of the tile; every hidden feature is
    one dense (8,128) array and each layer is an unrolled scalar-broadcast FMA
    chain on the VPU (no MXU, no cross-lane traffic)."""
    xb = x_ref[...]                                        # (8, 128) f32

    def sigmoid(z):
        # exp + approximate reciprocal both run on the EUP slot.
        return pl.reciprocal(1.0 + jnp.exp(-z), approx=True)

    def dense(h_in, n_in, n_out, w_off, b_off):
        h_out = []
        for j in range(n_out):
            acc = h_in[0] * p_ref[w_off + j]               # w[0, j]
            for k in range(1, n_in):
                acc = acc + h_in[k] * p_ref[w_off + k * n_out + j]
            h_out.append(acc + p_ref[b_off + j])
        return h_out

    h = dense([xb], 1, 8, OFF_W1, OFF_B1)
    h = [sigmoid(t) for t in h]
    h = dense(h, 8, 4, OFF_W2, OFF_B2)
    h = [sigmoid(t) for t in h]
    h = dense(h, 4, 8, OFF_W3, OFF_B3)
    h = [sigmoid(t) for t in h]
    h = dense(h, 8, 4, OFF_W4, OFF_B4)
    h = [jnp.maximum(t, 0.0) for t in h]
    h = dense(h, 4, 1, OFF_W5, OFF_B5)
    o_ref[...] = jnp.maximum(h[0], 0.0)


def pack_params(params):
    """Flatten (w, b) pairs into a single (133,) f32 vector (one SMEM DMA)."""
    flat = []
    for w, b in params:
        flat.append(w.reshape(-1))
        flat.append(b.reshape(-1))
    packed = jnp.concatenate(flat).astype(jnp.float32)
    assert packed.shape == (N_PARAMS,)
    return packed


def net_forward(x, params, *, block_rows=BLOCK_ROWS):
    """x: (B, 1) float32 -> (B, 1) float32."""
    B = x.shape[0]
    blk = block_rows * LANE
    Bp = ((B + blk - 1) // blk) * blk                      # pad batch to block
    xf = jnp.pad(x.reshape(-1), (0, Bp - B)).reshape(Bp // LANE, LANE)
    packed = pack_params(params)

    out = pl.pallas_call(
        mlp_kernel,
        out_shape=jax.ShapeDtypeStruct((Bp // LANE, LANE), jnp.float32),
        grid=(Bp // blk,),
        in_specs=[
            pl.BlockSpec(memory_space=pltpu.MemorySpace.SMEM),   # packed params
            pl.BlockSpec((block_rows, LANE), lambda i: (i, 0)),  # x tile
        ],
        out_specs=pl.BlockSpec((block_rows, LANE), lambda i: (i, 0)),
        compiler_params=pltpu.CompilerParams(
            dimension_semantics=("parallel",)),                   # 2 TCs on v7x
    )(packed, xf)

    return out.reshape(-1)[:B].reshape(B, 1)


# ---- reference + test ------------------------------------------------------
def init_linear_params(key, fan_in, fan_out):
    """torch.nn.Linear default init: U(-1/sqrt(fan_in), 1/sqrt(fan_in)).
    Weight stored (in, out) so reference does x @ W (== x @ W_torch.T)."""
    kw, kb = jax.random.split(key)
    bound = 1.0 / jnp.sqrt(jnp.float32(fan_in))
    w = jax.random.uniform(kw, (fan_in, fan_out), jnp.float32, -bound, bound)
    b = jax.random.uniform(kb, (fan_out,), jnp.float32, -bound, bound)
    return w, b


def reference_forward(x, params):
    (w1, b1), (w2, b2), (w3, b3), (w4, b4), (w5, b5) = params
    h = jax.nn.sigmoid(x @ w1 + b1)
    h = jax.nn.sigmoid(h @ w2 + b2)
    h = jax.nn.sigmoid(h @ w3 + b3)
    h = jnp.maximum(h @ w4 + b4, 0.0)
    h = jnp.maximum(h @ w5 + b5, 0.0)
    return h


if __name__ == "__main__":
    key = jax.random.PRNGKey(0)
    k_x, k1, k2, k3, k4, k5 = jax.random.split(key, 6)

    params = [
        init_linear_params(k1, 1, 8),
        init_linear_params(k2, 8, 4),
        init_linear_params(k3, 4, 8),
        init_linear_params(k4, 8, 4),
        init_linear_params(k5, 4, 1),
    ]

    # (B, 1) scalar-feature batch, as implied by Linear(1, 8).
    # B chosen so the kernel exercises both the batch grid (3 steps of 1024)
    # and the tail padding path, while staying tiny.
    B = 2300
    x = jax.random.normal(k_x, (B, 1), jnp.float32)

    out = net_forward(x, params)
    out = jax.block_until_ready(out)

    ref = reference_forward(x, params)
    assert out.shape == (B, 1)
    # slightly loose tolerance: sigmoid uses the EUP approximate reciprocal
    # (~2^-12 relative error), which is well inside 5e-3 after 5 tiny layers.
    assert jnp.allclose(out, ref, atol=5e-3, rtol=5e-3), (
        float(jnp.max(jnp.abs(out - ref))))

    print("KERNEL_OK")
</pallas_src>

<mosaic_0001>
module attributes {stable_mosaic.version = 11 : i64} {
  func.func @mlp_kernel(%arg0: i32, %arg1: memref<133xf32, #tpu.memory_space<smem>>, %arg2: memref<8x128xf32, #tpu.memory_space<vmem>>, %arg3: memref<8x128xf32, #tpu.memory_space<vmem>>) attributes {dimension_semantics = [#tpu.dimension_semantics<parallel>], iteration_bounds = array<i64: 3>, scalar_prefetch = 0 : i64, scratch_operands = 0 : i64, tpu.core_type = #tpu.core_type<tc>, window_params = [{transform_indices = @transform_0, window_bounds = array<i64: 133>}, {transform_indices = @transform_1, window_bounds = array<i64: 8, 128>}, {transform_indices = @transform_2, window_bounds = array<i64: 8, 128>}]} {
    %c0 = arith.constant 0 : index
    %c0_0 = arith.constant 0 : index
    %0 = vector.load %arg2[%c0, %c0_0] : memref<8x128xf32, #tpu.memory_space<vmem>>, vector<8x128xf32>
    %c0_1 = arith.constant 0 : index
    %1 = memref.load %arg1[%c0_1] : memref<133xf32, #tpu.memory_space<smem>>
    %2 = vector.broadcast %1 : f32 to vector<8x128xf32>
    %3 = arith.mulf %0, %2 : vector<8x128xf32>
    %c8 = arith.constant 8 : index
    %4 = memref.load %arg1[%c8] : memref<133xf32, #tpu.memory_space<smem>>
    %5 = vector.broadcast %4 : f32 to vector<8x128xf32>
    %6 = arith.addf %3, %5 : vector<8x128xf32>
    %c1 = arith.constant 1 : index
    %7 = memref.load %arg1[%c1] : memref<133xf32, #tpu.memory_space<smem>>
    %8 = vector.broadcast %7 : f32 to vector<8x128xf32>
    %9 = arith.mulf %0, %8 : vector<8x128xf32>
    %c9 = arith.constant 9 : index
    %10 = memref.load %arg1[%c9] : memref<133xf32, #tpu.memory_space<smem>>
    %11 = vector.broadcast %10 : f32 to vector<8x128xf32>
    %12 = arith.addf %9, %11 : vector<8x128xf32>
    %c2 = arith.constant 2 : index
    %13 = memref.load %arg1[%c2] : memref<133xf32, #tpu.memory_space<smem>>
    %14 = vector.broadcast %13 : f32 to vector<8x128xf32>
    %15 = arith.mulf %0, %14 : vector<8x128xf32>
    %c10 = arith.constant 10 : index
    %16 = memref.load %arg1[%c10] : memref<133xf32, #tpu.memory_space<smem>>
    %17 = vector.broadcast %16 : f32 to vector<8x128xf32>
    %18 = arith.addf %15, %17 : vector<8x128xf32>
    %c3 = arith.constant 3 : index
    %19 = memref.load %arg1[%c3] : memref<133xf32, #tpu.memory_space<smem>>
    %20 = vector.broadcast %19 : f32 to vector<8x128xf32>
    %21 = arith.mulf %0, %20 : vector<8x128xf32>
    %c11 = arith.constant 11 : index
    %22 = memref.load %arg1[%c11] : memref<133xf32, #tpu.memory_space<smem>>
    %23 = vector.broadcast %22 : f32 to vector<8x128xf32>
    %24 = arith.addf %21, %23 : vector<8x128xf32>
    %c4 = arith.constant 4 : index
    %25 = memref.load %arg1[%c4] : memref<133xf32, #tpu.memory_space<smem>>
    %26 = vector.broadcast %25 : f32 to vector<8x128xf32>
    %27 = arith.mulf %0, %26 : vector<8x128xf32>
    %c12 = arith.constant 12 : index
    %28 = memref.load %arg1[%c12] : memref<133xf32, #tpu.memory_space<smem>>
    %29 = vector.broadcast %28 : f32 to vector<8x128xf32>
    %30 = arith.addf %27, %29 : vector<8x128xf32>
    %c5 = arith.constant 5 : index
    %31 = memref.load %arg1[%c5] : memref<133xf32, #tpu.memory_space<smem>>
    %32 = vector.broadcast %31 : f32 to vector<8x128xf32>
    %33 = arith.mulf %0, %32 : vector<8x128xf32>
    %c13 = arith.constant 13 : index
    %34 = memref.load %arg1[%c13] : memref<133xf32, #tpu.memory_space<smem>>
    %35 = vector.broadcast %34 : f32 to vector<8x128xf32>
    %36 = arith.addf %33, %35 : vector<8x128xf32>
    %c6 = arith.constant 6 : index
    %37 = memref.load %arg1[%c6] : memref<133xf32, #tpu.memory_space<smem>>
    %38 = vector.broadcast %37 : f32 to vector<8x128xf32>
    %39 = arith.mulf %0, %38 : vector<8x128xf32>
    %c14 = arith.constant 14 : index
    %40 = memref.load %arg1[%c14] : memref<133xf32, #tpu.memory_space<smem>>
    %41 = vector.broadcast %40 : f32 to vector<8x128xf32>
    %42 = arith.addf %39, %41 : vector<8x128xf32>
    %c7 = arith.constant 7 : index
    %43 = memref.load %arg1[%c7] : memref<133xf32, #tpu.memory_space<smem>>
    %44 = vector.broadcast %43 : f32 to vector<8x128xf32>
    %45 = arith.mulf %0, %44 : vector<8x128xf32>
    %c15 = arith.constant 15 : index
    %46 = memref.load %arg1[%c15] : memref<133xf32, #tpu.memory_space<smem>>
    %47 = vector.broadcast %46 : f32 to vector<8x128xf32>
    %48 = arith.addf %45, %47 : vector<8x128xf32>
    %cst = arith.constant 0.000000e+00 : f32
    %49 = vector.broadcast %cst : f32 to vector<8x128xf32>
    %50 = arith.subf %49, %6 : vector<8x128xf32>
    %51 = math.exp %50 : vector<8x128xf32>
    %cst_2 = arith.constant 1.000000e+00 : f32
    %52 = vector.broadcast %cst_2 : f32 to vector<8x128xf32>
    %53 = arith.addf %52, %51 : vector<8x128xf32>
    %54 = tpu.reciprocal %53 {approx = true} : vector<8x128xf32> -> vector<8x128xf32>
    %cst_3 = arith.constant 0.000000e+00 : f32
    %55 = vector.broadcast %cst_3 : f32 to vector<8x128xf32>
    %56 = arith.subf %55, %12 : vector<8x128xf32>
    %57 = math.exp %56 : vector<8x128xf32>
    %cst_4 = arith.constant 1.000000e+00 : f32
    %58 = vector.broadcast %cst_4 : f32 to vector<8x128xf32>
    %59 = arith.addf %58, %57 : vector<8x128xf32>
    %60 = tpu.reciprocal %59 {approx = true} : vector<8x128xf32> -> vector<8x128xf32>
    %cst_5 = arith.constant 0.000000e+00 : f32
    %61 = vector.broadcast %cst_5 : f32 to vector<8x128xf32>
    %62 = arith.subf %61, %18 : vector<8x128xf32>
    %63 = math.exp %62 : vector<8x128xf32>
    %cst_6 = arith.constant 1.000000e+00 : f32
    %64 = vector.broadcast %cst_6 : f32 to vector<8x128xf32>
    %65 = arith.addf %64, %63 : vector<8x128xf32>
    %66 = tpu.reciprocal %65 {approx = true} : vector<8x128xf32> -> vector<8x128xf32>
    %cst_7 = arith.constant 0.000000e+00 : f32
    %67 = vector.broadcast %cst_7 : f32 to vector<8x128xf32>
    %68 = arith.subf %67, %24 : vector<8x128xf32>
    %69 = math.exp %68 : vector<8x128xf32>
    %cst_8 = arith.constant 1.000000e+00 : f32
    %70 = vector.broadcast %cst_8 : f32 to vector<8x128xf32>
    %71 = arith.addf %70, %69 : vector<8x128xf32>
    %72 = tpu.reciprocal %71 {approx = true} : vector<8x128xf32> -> vector<8x128xf32>
    %cst_9 = arith.constant 0.000000e+00 : f32
    %73 = vector.broadcast %cst_9 : f32 to vector<8x128xf32>
    %74 = arith.subf %73, %30 : vector<8x128xf32>
    %75 = math.exp %74 : vector<8x128xf32>
    %cst_10 = arith.constant 1.000000e+00 : f32
    %76 = vector.broadcast %cst_10 : f32 to vector<8x128xf32>
    %77 = arith.addf %76, %75 : vector<8x128xf32>
    %78 = tpu.reciprocal %77 {approx = true} : vector<8x128xf32> -> vector<8x128xf32>
    %cst_11 = arith.constant 0.000000e+00 : f32
    %79 = vector.broadcast %cst_11 : f32 to vector<8x128xf32>
    %80 = arith.subf %79, %36 : vector<8x128xf32>
    %81 = math.exp %80 : vector<8x128xf32>
    %cst_12 = arith.constant 1.000000e+00 : f32
    %82 = vector.broadcast %cst_12 : f32 to vector<8x128xf32>
    %83 = arith.addf %82, %81 : vector<8x128xf32>
    %84 = tpu.reciprocal %83 {approx = true} : vector<8x128xf32> -> vector<8x128xf32>
    %cst_13 = arith.constant 0.000000e+00 : f32
    %85 = vector.broadcast %cst_13 : f32 to vector<8x128xf32>
    %86 = arith.subf %85, %42 : vector<8x128xf32>
    %87 = math.exp %86 : vector<8x128xf32>
    %cst_14 = arith.constant 1.000000e+00 : f32
    %88 = vector.broadcast %cst_14 : f32 to vector<8x128xf32>
    %89 = arith.addf %88, %87 : vector<8x128xf32>
    %90 = tpu.reciprocal %89 {approx = true} : vector<8x128xf32> -> vector<8x128xf32>
    %cst_15 = arith.constant 0.000000e+00 : f32
    %91 = vector.broadcast %cst_15 : f32 to vector<8x128xf32>
    %92 = arith.subf %91, %48 : vector<8x128xf32>
    %93 = math.exp %92 : vector<8x128xf32>
    %cst_16 = arith.constant 1.000000e+00 : f32
    %94 = vector.broadcast %cst_16 : f32 to vector<8x128xf32>
    %95 = arith.addf %94, %93 : vector<8x128xf32>
    %96 = tpu.reciprocal %95 {approx = true} : vector<8x128xf32> -> vector<8x128xf32>
    %c16 = arith.constant 16 : index
    %97 = memref.load %arg1[%c16] : memref<133xf32, #tpu.memory_space<smem>>
    %98 = vector.broadcast %97 : f32 to vector<8x128xf32>
    %99 = arith.mulf %54, %98 : vector<8x128xf32>
    %c20 = arith.constant 20 : index
    %100 = memref.load %arg1[%c20] : memref<133xf32, #tpu.memory_space<smem>>
    %101 = vector.broadcast %100 : f32 to vector<8x128xf32>
    %102 = arith.mulf %60, %101 : vector<8x128xf32>
    %103 = arith.addf %99, %102 : vector<8x128xf32>
    %c24 = arith.constant 24 : index
    %104 = memref.load %arg1[%c24] : memref<133xf32, #tpu.memory_space<smem>>
    %105 = vector.broadcast %104 : f32 to vector<8x128xf32>
    %106 = arith.mulf %66, %105 : vector<8x128xf32>
    %107 = arith.addf %103, %106 : vector<8x128xf32>
    %c28 = arith.constant 28 : index
    %108 = memref.load %arg1[%c28] : memref<133xf32, #tpu.memory_space<smem>>
    %109 = vector.broadcast %108 : f32 to vector<8x128xf32>
    %110 = arith.mulf %72, %109 : vector<8x128xf32>
    %111 = arith.addf %107, %110 : vector<8x128xf32>
    %c32 = arith.constant 32 : index
    %112 = memref.load %arg1[%c32] : memref<133xf32, #tpu.memory_space<smem>>
    %113 = vector.broadcast %112 : f32 to vector<8x128xf32>
    %114 = arith.mulf %78, %113 : vector<8x128xf32>
    %115 = arith.addf %111, %114 : vector<8x128xf32>
    %c36 = arith.constant 36 : index
    %116 = memref.load %arg1[%c36] : memref<133xf32, #tpu.memory_space<smem>>
    %117 = vector.broadcast %116 : f32 to vector<8x128xf32>
    %118 = arith.mulf %84, %117 : vector<8x128xf32>
    %119 = arith.addf %115, %118 : vector<8x128xf32>
    %c40 = arith.constant 40 : index
    %120 = memref.load %arg1[%c40] : memref<133xf32, #tpu.memory_space<smem>>
    %121 = vector.broadcast %120 : f32 to vector<8x128xf32>
    %122 = arith.mulf %90, %121 : vector<8x128xf32>
    %123 = arith.addf %119, %122 : vector<8x128xf32>
    %c44 = arith.constant 44 : index
    %124 = memref.load %arg1[%c44] : memref<133xf32, #tpu.memory_space<smem>>
    %125 = vector.broadcast %124 : f32 to vector<8x128xf32>
    %126 = arith.mulf %96, %125 : vector<8x128xf32>
    %127 = arith.addf %123, %126 : vector<8x128xf32>
    %c48 = arith.constant 48 : index
    %128 = memref.load %arg1[%c48] : memref<133xf32, #tpu.memory_space<smem>>
    %129 = vector.broadcast %128 : f32 to vector<8x128xf32>
    %130 = arith.addf %127, %129 : vector<8x128xf32>
    %c17 = arith.constant 17 : index
    %131 = memref.load %arg1[%c17] : memref<133xf32, #tpu.memory_space<smem>>
    %132 = vector.broadcast %131 : f32 to vector<8x128xf32>
    %133 = arith.mulf %54, %132 : vector<8x128xf32>
    %c21 = arith.constant 21 : index
    %134 = memref.load %arg1[%c21] : memref<133xf32, #tpu.memory_space<smem>>
    %135 = vector.broadcast %134 : f32 to vector<8x128xf32>
    %136 = arith.mulf %60, %135 : vector<8x128xf32>
    %137 = arith.addf %133, %136 : vector<8x128xf32>
    %c25 = arith.constant 25 : index
    %138 = memref.load %arg1[%c25] : memref<133xf32, #tpu.memory_space<smem>>
    %139 = vector.broadcast %138 : f32 to vector<8x128xf32>
    %140 = arith.mulf %66, %139 : vector<8x128xf32>
    %141 = arith.addf %137, %140 : vector<8x128xf32>
    %c29 = arith.constant 29 : index
    %142 = memref.load %arg1[%c29] : memref<133xf32, #tpu.memory_space<smem>>
    %143 = vector.broadcast %142 : f32 to vector<8x128xf32>
    %144 = arith.mulf %72, %143 : vector<8x128xf32>
    %145 = arith.addf %141, %144 : vector<8x128xf32>
    %c33 = arith.constant 33 : index
    %146 = memref.load %arg1[%c33] : memref<133xf32, #tpu.memory_space<smem>>
    %147 = vector.broadcast %146 : f32 to vector<8x128xf32>
    %148 = arith.mulf %78, %147 : vector<8x128xf32>
    %149 = arith.addf %145, %148 : vector<8x128xf32>
    %c37 = arith.constant 37 : index
    %150 = memref.load %arg1[%c37] : memref<133xf32, #tpu.memory_space<smem>>
    %151 = vector.broadcast %150 : f32 to vector<8x128xf32>
    %152 = arith.mulf %84, %151 : vector<8x128xf32>
    %153 = arith.addf %149, %152 : vector<8x128xf32>
    %c41 = arith.constant 41 : index
    %154 = memref.load %arg1[%c41] : memref<133xf32, #tpu.memory_space<smem>>
    %155 = vector.broadcast %154 : f32 to vector<8x128xf32>
    %156 = arith.mulf %90, %155 : vector<8x128xf32>
    %157 = arith.addf %153, %156 : vector<8x128xf32>
    %c45 = arith.constant 45 : index
    %158 = memref.load %arg1[%c45] : memref<133xf32, #tpu.memory_space<smem>>
    %159 = vector.broadcast %158 : f32 to vector<8x128xf32>
    %160 = arith.mulf %96, %159 : vector<8x128xf32>
    %161 = arith.addf %157, %160 : vector<8x128xf32>
    %c49 = arith.constant 49 : index
    %162 = memref.load %arg1[%c49] : memref<133xf32, #tpu.memory_space<smem>>
    %163 = vector.broadcast %162 : f32 to vector<8x128xf32>
    %164 = arith.addf %161, %163 : vector<8x128xf32>
    %c18 = arith.constant 18 : index
    %165 = memref.load %arg1[%c18] : memref<133xf32, #tpu.memory_space<smem>>
    %166 = vector.broadcast %165 : f32 to vector<8x128xf32>
    %167 = arith.mulf %54, %166 : vector<8x128xf32>
    %c22 = arith.constant 22 : index
    %168 = memref.load %arg1[%c22] : memref<133xf32, #tpu.memory_space<smem>>
    %169 = vector.broadcast %168 : f32 to vector<8x128xf32>
    %170 = arith.mulf %60, %169 : vector<8x128xf32>
    %171 = arith.addf %167, %170 : vector<8x128xf32>
    %c26 = arith.constant 26 : index
    %172 = memref.load %arg1[%c26] : memref<133xf32, #tpu.memory_space<smem>>
    %173 = vector.broadcast %172 : f32 to vector<8x128xf32>
    %174 = arith.mulf %66, %173 : vector<8x128xf32>
    %175 = arith.addf %171, %174 : vector<8x128xf32>
    %c30 = arith.constant 30 : index
    %176 = memref.load %arg1[%c30] : memref<133xf32, #tpu.memory_space<smem>>
    %177 = vector.broadcast %176 : f32 to vector<8x128xf32>
    %178 = arith.mulf %72, %177 : vector<8x128xf32>
    %179 = arith.addf %175, %178 : vector<8x128xf32>
    %c34 = arith.constant 34 : index
    %180 = memref.load %arg1[%c34] : memref<133xf32, #tpu.memory_space<smem>>
    %181 = vector.broadcast %180 : f32 to vector<8x128xf32>
    %182 = arith.mulf %78, %181 : vector<8x128xf32>
    %183 = arith.addf %179, %182 : vector<8x128xf32>
    %c38 = arith.constant 38 : index
    %184 = memref.load %arg1[%c38] : memref<133xf32, #tpu.memory_space<smem>>
    %185 = vector.broadcast %184 : f32 to vector<8x128xf32>
    %186 = arith.mulf %84, %185 : vector<8x128xf32>
    %187 = arith.addf %183, %186 : vector<8x128xf32>
    %c42 = arith.constant 42 : index
    %188 = memref.load %arg1[%c42] : memref<133xf32, #tpu.memory_space<smem>>
    %189 = vector.broadcast %188 : f32 to vector<8x128xf32>
    %190 = arith.mulf %90, %189 : vector<8x128xf32>
    %191 = arith.addf %187, %190 : vector<8x128xf32>
    %c46 = arith.constant 46 : index
    %192 = memref.load %arg1[%c46] : memref<133xf32, #tpu.memory_space<smem>>
    %193 = vector.broadcast %192 : f32 to vector<8x128xf32>
    %194 = arith.mulf %96, %193 : vector<8x128xf32>
    %195 = arith.addf %191, %194 : vector<8x128xf32>
    %c50 = arith.constant 50 : index
    %196 = memref.load %arg1[%c50] : memref<133xf32, #tpu.memory_space<smem>>
    %197 = vector.broadcast %196 : f32 to vector<8x128xf32>
    %198 = arith.addf %195, %197 : vector<8x128xf32>
    %c19 = arith.constant 19 : index
    %199 = memref.load %arg1[%c19] : memref<133xf32, #tpu.memory_space<smem>>
    %200 = vector.broadcast %199 : f32 to vector<8x128xf32>
    %201 = arith.mulf %54, %200 : vector<8x128xf32>
    %c23 = arith.constant 23 : index
    %202 = memref.load %arg1[%c23] : memref<133xf32, #tpu.memory_space<smem>>
    %203 = vector.broadcast %202 : f32 to vector<8x128xf32>
    %204 = arith.mulf %60, %203 : vector<8x128xf32>
    %205 = arith.addf %201, %204 : vector<8x128xf32>
    %c27 = arith.constant 27 : index
    %206 = memref.load %arg1[%c27] : memref<133xf32, #tpu.memory_space<smem>>
    %207 = vector.broadcast %206 : f32 to vector<8x128xf32>
    %208 = arith.mulf %66, %207 : vector<8x128xf32>
    %209 = arith.addf %205, %208 : vector<8x128xf32>
    %c31 = arith.constant 31 : index
    %210 = memref.load %arg1[%c31] : memref<133xf32, #tpu.memory_space<smem>>
    %211 = vector.broadcast %210 : f32 to vector<8x128xf32>
    %212 = arith.mulf %72, %211 : vector<8x128xf32>
    %213 = arith.addf %209, %212 : vector<8x128xf32>
    %c35 = arith.constant 35 : index
    %214 = memref.load %arg1[%c35] : memref<133xf32, #tpu.memory_space<smem>>
    %215 = vector.broadcast %214 : f32 to vector<8x128xf32>
    %216 = arith.mulf %78, %215 : vector<8x128xf32>
    %217 = arith.addf %213, %216 : vector<8x128xf32>
    %c39 = arith.constant 39 : index
    %218 = memref.load %arg1[%c39] : memref<133xf32, #tpu.memory_space<smem>>
    %219 = vector.broadcast %218 : f32 to vector<8x128xf32>
    %220 = arith.mulf %84, %219 : vector<8x128xf32>
    %221 = arith.addf %217, %220 : vector<8x128xf32>
    %c43 = arith.constant 43 : index
    %222 = memref.load %arg1[%c43] : memref<133xf32, #tpu.memory_space<smem>>
    %223 = vector.broadcast %222 : f32 to vector<8x128xf32>
    %224 = arith.mulf %90, %223 : vector<8x128xf32>
    %225 = arith.addf %221, %224 : vector<8x128xf32>
    %c47 = arith.constant 47 : index
    %226 = memref.load %arg1[%c47] : memref<133xf32, #tpu.memory_space<smem>>
    %227 = vector.broadcast %226 : f32 to vector<8x128xf32>
    %228 = arith.mulf %96, %227 : vector<8x128xf32>
    %229 = arith.addf %225, %228 : vector<8x128xf32>
    %c51 = arith.constant 51 : index
    %230 = memref.load %arg1[%c51] : memref<133xf32, #tpu.memory_space<smem>>
    %231 = vector.broadcast %230 : f32 to vector<8x128xf32>
    %232 = arith.addf %229, %231 : vector<8x128xf32>
    %cst_17 = arith.constant 0.000000e+00 : f32
    %233 = vector.broadcast %cst_17 : f32 to vector<8x128xf32>
    %234 = arith.subf %233, %130 : vector<8x128xf32>
    %235 = math.exp %234 : vector<8x128xf32>
    %cst_18 = arith.constant 1.000000e+00 : f32
    %236 = vector.broadcast %cst_18 : f32 to vector<8x128xf32>
    %237 = arith.addf %236, %235 : vector<8x128xf32>
    %238 = tpu.reciprocal %237 {approx = true} : vector<8x128xf32> -> vector<8x128xf32>
    %cst_19 = arith.constant 0.000000e+00 : f32
    %239 = vector.broadcast %cst_19 : f32 to vector<8x128xf32>
    %240 = arith.subf %239, %164 : vector<8x128xf32>
    %241 = math.exp %240 : vector<8x128xf32>
    %cst_20 = arith.constant 1.000000e+00 : f32
    %242 = vector.broadcast %cst_20 : f32 to vector<8x128xf32>
    %243 = arith.addf %242, %241 : vector<8x128xf32>
    %244 = tpu.reciprocal %243 {approx = true} : vector<8x128xf32> -> vector<8x128xf32>
    %cst_21 = arith.constant 0.000000e+00 : f32
    %245 = vector.broadcast %cst_21 : f32 to vector<8x128xf32>
    %246 = arith.subf %245, %198 : vector<8x128xf32>
    %247 = math.exp %246 : vector<8x128xf32>
    %cst_22 = arith.constant 1.000000e+00 : f32
    %248 = vector.broadcast %cst_22 : f32 to vector<8x128xf32>
    %249 = arith.addf %248, %247 : vector<8x128xf32>
    %250 = tpu.reciprocal %249 {approx = true} : vector<8x128xf32> -> vector<8x128xf32>
    %cst_23 = arith.constant 0.000000e+00 : f32
    %251 = vector.broadcast %cst_23 : f32 to vector<8x128xf32>
    %252 = arith.subf %251, %232 : vector<8x128xf32>
    %253 = math.exp %252 : vector<8x128xf32>
    %cst_24 = arith.constant 1.000000e+00 : f32
    %254 = vector.broadcast %cst_24 : f32 to vector<8x128xf32>
    %255 = arith.addf %254, %253 : vector<8x128xf32>
    %256 = tpu.reciprocal %255 {approx = true} : vector<8x128xf32> -> vector<8x128xf32>
    %c52 = arith.constant 52 : index
    %257 = memref.load %arg1[%c52] : memref<133xf32, #tpu.memory_space<smem>>
    %258 = vector.broadcast %257 : f32 to vector<8x128xf32>
    %259 = arith.mulf %238, %258 : vector<8x128xf32>
    %c60 = arith.constant 60 : index
    %260 = memref.load %arg1[%c60] : memref<133xf32, #tpu.memory_space<smem>>
    %261 = vector.broadcast %260 : f32 to vector<8x128xf32>
    %262 = arith.mulf %244, %261 : vector<8x128xf32>
    %263 = arith.addf %259, %262 : vector<8x128xf32>
    %c68 = arith.constant 68 : index
    %264 = memref.load %arg1[%c68] : memref<133xf32, #tpu.memory_space<smem>>
    %265 = vector.broadcast %264 : f32 to vector<8x128xf32>
    %266 = arith.mulf %250, %265 : vector<8x128xf32>
    %267 = arith.addf %263, %266 : vector<8x128xf32>
    %c76 = arith.constant 76 : index
    %268 = memref.load %arg1[%c76] : memref<133xf32, #tpu.memory_space<smem>>
    %269 = vector.broadcast %268 : f32 to vector<8x128xf32>
    %270 = arith.mulf %256, %269 : vector<8x128xf32>
    %271 = arith.addf %267, %270 : vector<8x128xf32>
    %c84 = arith.constant 84 : index
    %272 = memref.load %arg1[%c84] : memref<133xf32, #tpu.memory_space<smem>>
    %273 = vector.broadcast %272 : f32 to vector<8x128xf32>
    %274 = arith.addf %271, %273 : vector<8x128xf32>
    %c53 = arith.constant 53 : index
    %275 = memref.load %arg1[%c53] : memref<133xf32, #tpu.memory_space<smem>>
    %276 = vector.broadcast %275 : f32 to vector<8x128xf32>
    %277 = arith.mulf %238, %276 : vector<8x128xf32>
    %c61 = arith.constant 61 : index
    %278 = memref.load %arg1[%c61] : memref<133xf32, #tpu.memory_space<smem>>
    %279 = vector.broadcast %278 : f32 to vector<8x128xf32>
    %280 = arith.mulf %244, %279 : vector<8x128xf32>
    %281 = arith.addf %277, %280 : vector<8x128xf32>
    %c69 = arith.constant 69 : index
    %282 = memref.load %arg1[%c69] : memref<133xf32, #tpu.memory_space<smem>>
    %283 = vector.broadcast %282 : f32 to vector<8x128xf32>
    %284 = arith.mulf %250, %283 : vector<8x128xf32>
    %285 = arith.addf %281, %284 : vector<8x128xf32>
    %c77 = arith.constant 77 : index
    %286 = memref.load %arg1[%c77] : memref<133xf32, #tpu.memory_space<smem>>
    %287 = vector.broadcast %286 : f32 to vector<8x128xf32>
    %288 = arith.mulf %256, %287 : vector<8x128xf32>
    %289 = arith.addf %285, %288 : vector<8x128xf32>
    %c85 = arith.constant 85 : index
    %290 = memref.load %arg1[%c85] : memref<133xf32, #tpu.memory_space<smem>>
    %291 = vector.broadcast %290 : f32 to vector<8x128xf32>
    %292 = arith.addf %289, %291 : vector<8x128xf32>
    %c54 = arith.constant 54 : index
    %293 = memref.load %arg1[%c54] : memref<133xf32, #tpu.memory_space<smem>>
    %294 = vector.broadcast %293 : f32 to vector<8x128xf32>
    %295 = arith.mulf %238, %294 : vector<8x128xf32>
    %c62 = arith.constant 62 : index
    %296 = memref.load %arg1[%c62] : memref<133xf32, #tpu.memory_space<smem>>
    %297 = vector.broadcast %296 : f32 to vector<8x128xf32>
    %298 = arith.mulf %244, %297 : vector<8x128xf32>
    %299 = arith.addf %295, %298 : vector<8x128xf32>
    %c70 = arith.constant 70 : index
    %300 = memref.load %arg1[%c70] : memref<133xf32, #tpu.memory_space<smem>>
    %301 = vector.broadcast %300 : f32 to vector<8x128xf32>
    %302 = arith.mulf %250, %301 : vector<8x128xf32>
    %303 = arith.addf %299, %302 : vector<8x128xf32>
    %c78 = arith.constant 78 : index
    %304 = memref.load %arg1[%c78] : memref<133xf32, #tpu.memory_space<smem>>
    %305 = vector.broadcast %304 : f32 to vector<8x128xf32>
    %306 = arith.mulf %256, %305 : vector<8x128xf32>
    %307 = arith.addf %303, %306 : vector<8x128xf32>
    %c86 = arith.constant 86 : index
    %308 = memref.load %arg1[%c86] : memref<133xf32, #tpu.memory_space<smem>>
    %309 = vector.broadcast %308 : f32 to vector<8x128xf32>
    %310 = arith.addf %307, %309 : vector<8x128xf32>
    %c55 = arith.constant 55 : index
    %311 = memref.load %arg1[%c55] : memref<133xf32, #tpu.memory_space<smem>>
    %312 = vector.broadcast %311 : f32 to vector<8x128xf32>
    %313 = arith.mulf %238, %312 : vector<8x128xf32>
    %c63 = arith.constant 63 : index
    %314 = memref.load %arg1[%c63] : memref<133xf32, #tpu.memory_space<smem>>
    %315 = vector.broadcast %314 : f32 to vector<8x128xf32>
    %316 = arith.mulf %244, %315 : vector<8x128xf32>
    %317 = arith.addf %313, %316 : vector<8x128xf32>
    %c71 = arith.constant 71 : index
    %318 = memref.load %arg1[%c71] : memref<133xf32, #tpu.memory_space<smem>>
    %319 = vector.broadcast %318 : f32 to vector<8x128xf32>
    %320 = arith.mulf %250, %319 : vector<8x128xf32>
    %321 = arith.addf %317, %320 : vector<8x128xf32>
    %c79 = arith.constant 79 : index
    %322 = memref.load %arg1[%c79] : memref<133xf32, #tpu.memory_space<smem>>
    %323 = vector.broadcast %322 : f32 to vector<8x128xf32>
    %324 = arith.mulf %256, %323 : vector<8x128xf32>
    %325 = arith.addf %321, %324 : vector<8x128xf32>
    %c87 = arith.constant 87 : index
    %326 = memref.load %arg1[%c87] : memref<133xf32, #tpu.memory_space<smem>>
    %327 = vector.broadcast %326 : f32 to vector<8x128xf32>
    %328 = arith.addf %325, %327 : vector<8x128xf32>
    %c56 = arith.constant 56 : index
    %329 = memref.load %arg1[%c56] : memref<133xf32, #tpu.memory_space<smem>>
    %330 = vector.broadcast %329 : f32 to vector<8x128xf32>
    %331 = arith.mulf %238, %330 : vector<8x128xf32>
    %c64 = arith.constant 64 : index
    %332 = memref.load %arg1[%c64] : memref<133xf32, #tpu.memory_space<smem>>
    %333 = vector.broadcast %332 : f32 to vector<8x128xf32>
    %334 = arith.mulf %244, %333 : vector<8x128xf32>
    %335 = arith.addf %331, %334 : vector<8x128xf32>
    %c72 = arith.constant 72 : index
    %336 = memref.load %arg1[%c72] : memref<133xf32, #tpu.memory_space<smem>>
    %337 = vector.broadcast %336 : f32 to vector<8x128xf32>
    %338 = arith.mulf %250, %337 : vector<8x128xf32>
    %339 = arith.addf %335, %338 : vector<8x128xf32>
    %c80 = arith.constant 80 : index
    %340 = memref.load %arg1[%c80] : memref<133xf32, #tpu.memory_space<smem>>
    %341 = vector.broadcast %340 : f32 to vector<8x128xf32>
    %342 = arith.mulf %256, %341 : vector<8x128xf32>
    %343 = arith.addf %339, %342 : vector<8x128xf32>
    %c88 = arith.constant 88 : index
    %344 = memref.load %arg1[%c88] : memref<133xf32, #tpu.memory_space<smem>>
    %345 = vector.broadcast %344 : f32 to vector<8x128xf32>
    %346 = arith.addf %343, %345 : vector<8x128xf32>
    %c57 = arith.constant 57 : index
    %347 = memref.load %arg1[%c57] : memref<133xf32, #tpu.memory_space<smem>>
    %348 = vector.broadcast %347 : f32 to vector<8x128xf32>
    %349 = arith.mulf %238, %348 : vector<8x128xf32>
    %c65 = arith.constant 65 : index
    %350 = memref.load %arg1[%c65] : memref<133xf32, #tpu.memory_space<smem>>
    %351 = vector.broadcast %350 : f32 to vector<8x128xf32>
    %352 = arith.mulf %244, %351 : vector<8x128xf32>
    %353 = arith.addf %349, %352 : vector<8x128xf32>
    %c73 = arith.constant 73 : index
    %354 = memref.load %arg1[%c73] : memref<133xf32, #tpu.memory_space<smem>>
    %355 = vector.broadcast %354 : f32 to vector<8x128xf32>
    %356 = arith.mulf %250, %355 : vector<8x128xf32>
    %357 = arith.addf %353, %356 : vector<8x128xf32>
    %c81 = arith.constant 81 : index
    %358 = memref.load %arg1[%c81] : memref<133xf32, #tpu.memory_space<smem>>
    %359 = vector.broadcast %358 : f32 to vector<8x128xf32>
    %360 = arith.mulf %256, %359 : vector<8x128xf32>
    %361 = arith.addf %357, %360 : vector<8x128xf32>
    %c89 = arith.constant 89 : index
    %362 = memref.load %arg1[%c89] : memref<133xf32, #tpu.memory_space<smem>>
    %363 = vector.broadcast %362 : f32 to vector<8x128xf32>
    %364 = arith.addf %361, %363 : vector<8x128xf32>
    %c58 = arith.constant 58 : index
    %365 = memref.load %arg1[%c58] : memref<133xf32, #tpu.memory_space<smem>>
    %366 = vector.broadcast %365 : f32 to vector<8x128xf32>
    %367 = arith.mulf %238, %366 : vector<8x128xf32>
    %c66 = arith.constant 66 : index
    %368 = memref.load %arg1[%c66] : memref<133xf32, #tpu.memory_space<smem>>
    %369 = vector.broadcast %368 : f32 to vector<8x128xf32>
    %370 = arith.mulf %244, %369 : vector<8x128xf32>
    %371 = arith.addf %367, %370 : vector<8x128xf32>
    %c74 = arith.constant 74 : index
    %372 = memref.load %arg1[%c74] : memref<133xf32, #tpu.memory_space<smem>>
    %373 = vector.broadcast %372 : f32 to vector<8x128xf32>
    %374 = arith.mulf %250, %373 : vector<8x128xf32>
    %375 = arith.addf %371, %374 : vector<8x128xf32>
    %c82 = arith.constant 82 : index
    %376 = memref.load %arg1[%c82] : memref<133xf32, #tpu.memory_space<smem>>
    %377 = vector.broadcast %376 : f32 to vector<8x128xf32>
    %378 = arith.mulf %256, %377 : vector<8x128xf32>
    %379 = arith.addf %375, %378 : vector<8x128xf32>
    %c90 = arith.constant 90 : index
    %380 = memref.load %arg1[%c90] : memref<133xf32, #tpu.memory_space<smem>>
    %381 = vector.broadcast %380 : f32 to vector<8x128xf32>
    %382 = arith.addf %379, %381 : vector<8x128xf32>
    %c59 = arith.constant 59 : index
    %383 = memref.load %arg1[%c59] : memref<133xf32, #tpu.memory_space<smem>>
    %384 = vector.broadcast %383 : f32 to vector<8x128xf32>
    %385 = arith.mulf %238, %384 : vector<8x128xf32>
    %c67 = arith.constant 67 : index
    %386 = memref.load %arg1[%c67] : memref<133xf32, #tpu.memory_space<smem>>
    %387 = vector.broadcast %386 : f32 to vector<8x128xf32>
    %388 = arith.mulf %244, %387 : vector<8x128xf32>
    %389 = arith.addf %385, %388 : vector<8x128xf32>
    %c75 = arith.constant 75 : index
    %390 = memref.load %arg1[%c75] : memref<133xf32, #tpu.memory_space<smem>>
    %391 = vector.broadcast %390 : f32 to vector<8x128xf32>
    %392 = arith.mulf %250, %391 : vector<8x128xf32>
    %393 = arith.addf %389, %392 : vector<8x128xf32>
    %c83 = arith.constant 83 : index
    %394 = memref.load %arg1[%c83] : memref<133xf32, #tpu.memory_space<smem>>
    %395 = vector.broadcast %394 : f32 to vector<8x128xf32>
    %396 = arith.mulf %256, %395 : vector<8x128xf32>
    %397 = arith.addf %393, %396 : vector<8x128xf32>
    %c91 = arith.constant 91 : index
    %398 = memref.load %arg1[%c91] : memref<133xf32, #tpu.memory_space<smem>>
    %399 = vector.broadcast %398 : f32 to vector<8x128xf32>
    %400 = arith.addf %397, %399 : vector<8x128xf32>
    %cst_25 = arith.constant 0.000000e+00 : f32
    %401 = vector.broadcast %cst_25 : f32 to vector<8x128xf32>
    %402 = arith.subf %401, %274 : vector<8x128xf32>
    %403 = math.exp %402 : vector<8x128xf32>
    %cst_26 = arith.constant 1.000000e+00 : f32
    %404 = vector.broadcast %cst_26 : f32 to vector<8x128xf32>
    %405 = arith.addf %404, %403 : vector<8x128xf32>
    %406 = tpu.reciprocal %405 {approx = true} : vector<8x128xf32> -> vector<8x128xf32>
    %cst_27 = arith.constant 0.000000e+00 : f32
    %407 = vector.broadcast %cst_27 : f32 to vector<8x128xf32>
    %408 = arith.subf %407, %292 : vector<8x128xf32>
    %409 = math.exp %408 : vector<8x128xf32>
    %cst_28 = arith.constant 1.000000e+00 : f32
    %410 = vector.broadcast %cst_28 : f32 to vector<8x128xf32>
    %411 = arith.addf %410, %409 : vector<8x128xf32>
    %412 = tpu.reciprocal %411 {approx = true} : vector<8x128xf32> -> vector<8x128xf32>
    %cst_29 = arith.constant 0.000000e+00 : f32
    %413 = vector.broadcast %cst_29 : f32 to vector<8x128xf32>
    %414 = arith.subf %413, %310 : vector<8x128xf32>
    %415 = math.exp %414 : vector<8x128xf32>
    %cst_30 = arith.constant 1.000000e+00 : f32
    %416 = vector.broadcast %cst_30 : f32 to vector<8x128xf32>
    %417 = arith.addf %416, %415 : vector<8x128xf32>
    %418 = tpu.reciprocal %417 {approx = true} : vector<8x128xf32> -> vector<8x128xf32>
    %cst_31 = arith.constant 0.000000e+00 : f32
    %419 = vector.broadcast %cst_31 : f32 to vector<8x128xf32>
    %420 = arith.subf %419, %328 : vector<8x128xf32>
    %421 = math.exp %420 : vector<8x128xf32>
    %cst_32 = arith.constant 1.000000e+00 : f32
    %422 = vector.broadcast %cst_32 : f32 to vector<8x128xf32>
    %423 = arith.addf %422, %421 : vector<8x128xf32>
    %424 = tpu.reciprocal %423 {approx = true} : vector<8x128xf32> -> vector<8x128xf32>
    %cst_33 = arith.constant 0.000000e+00 : f32
    %425 = vector.broadcast %cst_33 : f32 to vector<8x128xf32>
    %426 = arith.subf %425, %346 : vector<8x128xf32>
    %427 = math.exp %426 : vector<8x128xf32>
    %cst_34 = arith.constant 1.000000e+00 : f32
    %428 = vector.broadcast %cst_34 : f32 to vector<8x128xf32>
    %429 = arith.addf %428, %427 : vector<8x128xf32>
    %430 = tpu.reciprocal %429 {approx = true} : vector<8x128xf32> -> vector<8x128xf32>
    %cst_35 = arith.constant 0.000000e+00 : f32
    %431 = vector.broadcast %cst_35 : f32 to vector<8x128xf32>
    %432 = arith.subf %431, %364 : vector<8x128xf32>
    %433 = math.exp %432 : vector<8x128xf32>
    %cst_36 = arith.constant 1.000000e+00 : f32
    %434 = vector.broadcast %cst_36 : f32 to vector<8x128xf32>
    %435 = arith.addf %434, %433 : vector<8x128xf32>
    %436 = tpu.reciprocal %435 {approx = true} : vector<8x128xf32> -> vector<8x128xf32>
    %cst_37 = arith.constant 0.000000e+00 : f32
    %437 = vector.broadcast %cst_37 : f32 to vector<8x128xf32>
    %438 = arith.subf %437, %382 : vector<8x128xf32>
    %439 = math.exp %438 : vector<8x128xf32>
    %cst_38 = arith.constant 1.000000e+00 : f32
    %440 = vector.broadcast %cst_38 : f32 to vector<8x128xf32>
    %441 = arith.addf %440, %439 : vector<8x128xf32>
    %442 = tpu.reciprocal %441 {approx = true} : vector<8x128xf32> -> vector<8x128xf32>
    %cst_39 = arith.constant 0.000000e+00 : f32
    %443 = vector.broadcast %cst_39 : f32 to vector<8x128xf32>
    %444 = arith.subf %443, %400 : vector<8x128xf32>
    %445 = math.exp %444 : vector<8x128xf32>
    %cst_40 = arith.constant 1.000000e+00 : f32
    %446 = vector.broadcast %cst_40 : f32 to vector<8x128xf32>
    %447 = arith.addf %446, %445 : vector<8x128xf32>
    %448 = tpu.reciprocal %447 {approx = true} : vector<8x128xf32> -> vector<8x128xf32>
    %c92 = arith.constant 92 : index
    %449 = memref.load %arg1[%c92] : memref<133xf32, #tpu.memory_space<smem>>
    %450 = vector.broadcast %449 : f32 to vector<8x128xf32>
    %451 = arith.mulf %406, %450 : vector<8x128xf32>
    %c96 = arith.constant 96 : index
    %452 = memref.load %arg1[%c96] : memref<133xf32, #tpu.memory_space<smem>>
    %453 = vector.broadcast %452 : f32 to vector<8x128xf32>
    %454 = arith.mulf %412, %453 : vector<8x128xf32>
    %455 = arith.addf %451, %454 : vector<8x128xf32>
    %c100 = arith.constant 100 : index
    %456 = memref.load %arg1[%c100] : memref<133xf32, #tpu.memory_space<smem>>
    %457 = vector.broadcast %456 : f32 to vector<8x128xf32>
    %458 = arith.mulf %418, %457 : vector<8x128xf32>
    %459 = arith.addf %455, %458 : vector<8x128xf32>
    %c104 = arith.constant 104 : index
    %460 = memref.load %arg1[%c104] : memref<133xf32, #tpu.memory_space<smem>>
    %461 = vector.broadcast %460 : f32 to vector<8x128xf32>
    %462 = arith.mulf %424, %461 : vector<8x128xf32>
    %463 = arith.addf %459, %462 : vector<8x128xf32>
    %c108 = arith.constant 108 : index
    %464 = memref.load %arg1[%c108] : memref<133xf32, #tpu.memory_space<smem>>
    %465 = vector.broadcast %464 : f32 to vector<8x128xf32>
    %466 = arith.mulf %430, %465 : vector<8x128xf32>
    %467 = arith.addf %463, %466 : vector<8x128xf32>
    %c112 = arith.constant 112 : index
    %468 = memref.load %arg1[%c112] : memref<133xf32, #tpu.memory_space<smem>>
    %469 = vector.broadcast %468 : f32 to vector<8x128xf32>
    %470 = arith.mulf %436, %469 : vector<8x128xf32>
    %471 = arith.addf %467, %470 : vector<8x128xf32>
    %c116 = arith.constant 116 : index
    %472 = memref.load %arg1[%c116] : memref<133xf32, #tpu.memory_space<smem>>
    %473 = vector.broadcast %472 : f32 to vector<8x128xf32>
    %474 = arith.mulf %442, %473 : vector<8x128xf32>
    %475 = arith.addf %471, %474 : vector<8x128xf32>
    %c120 = arith.constant 120 : index
    %476 = memref.load %arg1[%c120] : memref<133xf32, #tpu.memory_space<smem>>
    %477 = vector.broadcast %476 : f32 to vector<8x128xf32>
    %478 = arith.mulf %448, %477 : vector<8x128xf32>
    %479 = arith.addf %475, %478 : vector<8x128xf32>
    %c124 = arith.constant 124 : index
    %480 = memref.load %arg1[%c124] : memref<133xf32, #tpu.memory_space<smem>>
    %481 = vector.broadcast %480 : f32 to vector<8x128xf32>
    %482 = arith.addf %479, %481 : vector<8x128xf32>
    %c93 = arith.constant 93 : index
    %483 = memref.load %arg1[%c93] : memref<133xf32, #tpu.memory_space<smem>>
    %484 = vector.broadcast %483 : f32 to vector<8x128xf32>
    %485 = arith.mulf %406, %484 : vector<8x128xf32>
    %c97 = arith.constant 97 : index
    %486 = memref.load %arg1[%c97] : memref<133xf32, #tpu.memory_space<smem>>
    %487 = vector.broadcast %486 : f32 to vector<8x128xf32>
    %488 = arith.mulf %412, %487 : vector<8x128xf32>
    %489 = arith.addf %485, %488 : vector<8x128xf32>
    %c101 = arith.constant 101 : index
    %490 = memref.load %arg1[%c101] : memref<133xf32, #tpu.memory_space<smem>>
    %491 = vector.broadcast %490 : f32 to vector<8x128xf32>
    %492 = arith.mulf %418, %491 : vector<8x128xf32>
    %493 = arith.addf %489, %492 : vector<8x128xf32>
    %c105 = arith.constant 105 : index
    %494 = memref.load %arg1[%c105] : memref<133xf32, #tpu.memory_space<smem>>
    %495 = vector.broadcast %494 : f32 to vector<8x128xf32>
    %496 = arith.mulf %424, %495 : vector<8x128xf32>
    %497 = arith.addf %493, %496 : vector<8x128xf32>
    %c109 = arith.constant 109 : index
    %498 = memref.load %arg1[%c109] : memref<133xf32, #tpu.memory_space<smem>>
    %499 = vector.broadcast %498 : f32 to vector<8x128xf32>
    %500 = arith.mulf %430, %499 : vector<8x128xf32>
    %501 = arith.addf %497, %500 : vector<8x128xf32>
    %c113 = arith.constant 113 : index
    %502 = memref.load %arg1[%c113] : memref<133xf32, #tpu.memory_space<smem>>
    %503 = vector.broadcast %502 : f32 to vector<8x128xf32>
    %504 = arith.mulf %436, %503 : vector<8x128xf32>
    %505 = arith.addf %501, %504 : vector<8x128xf32>
    %c117 = arith.constant 117 : index
    %506 = memref.load %arg1[%c117] : memref<133xf32, #tpu.memory_space<smem>>
    %507 = vector.broadcast %506 : f32 to vector<8x128xf32>
    %508 = arith.mulf %442, %507 : vector<8x128xf32>
    %509 = arith.addf %505, %508 : vector<8x128xf32>
    %c121 = arith.constant 121 : index
    %510 = memref.load %arg1[%c121] : memref<133xf32, #tpu.memory_space<smem>>
    %511 = vector.broadcast %510 : f32 to vector<8x128xf32>
    %512 = arith.mulf %448, %511 : vector<8x128xf32>
    %513 = arith.addf %509, %512 : vector<8x128xf32>
    %c125 = arith.constant 125 : index
    %514 = memref.load %arg1[%c125] : memref<133xf32, #tpu.memory_space<smem>>
    %515 = vector.broadcast %514 : f32 to vector<8x128xf32>
    %516 = arith.addf %513, %515 : vector<8x128xf32>
    %c94 = arith.constant 94 : index
    %517 = memref.load %arg1[%c94] : memref<133xf32, #tpu.memory_space<smem>>
    %518 = vector.broadcast %517 : f32 to vector<8x128xf32>
    %519 = arith.mulf %406, %518 : vector<8x128xf32>
    %c98 = arith.constant 98 : index
    %520 = memref.load %arg1[%c98] : memref<133xf32, #tpu.memory_space<smem>>
    %521 = vector.broadcast %520 : f32 to vector<8x128xf32>
    %522 = arith.mulf %412, %521 : vector<8x128xf32>
    %523 = arith.addf %519, %522 : vector<8x128xf32>
    %c102 = arith.constant 102 : index
    %524 = memref.load %arg1[%c102] : memref<133xf32, #tpu.memory_space<smem>>
    %525 = vector.broadcast %524 : f32 to vector<8x128xf32>
    %526 = arith.mulf %418, %525 : vector<8x128xf32>
    %527 = arith.addf %523, %526 : vector<8x128xf32>
    %c106 = arith.constant 106 : index
    %528 = memref.load %arg1[%c106] : memref<133xf32, #tpu.memory_space<smem>>
    %529 = vector.broadcast %528 : f32 to vector<8x128xf32>
    %530 = arith.mulf %424, %529 : vector<8x128xf32>
    %531 = arith.addf %527, %530 : vector<8x128xf32>
    %c110 = arith.constant 110 : index
    %532 = memref.load %arg1[%c110] : memref<133xf32, #tpu.memory_space<smem>>
    %533 = vector.broadcast %532 : f32 to vector<8x128xf32>
    %534 = arith.mulf %430, %533 : vector<8x128xf32>
    %535 = arith.addf %531, %534 : vector<8x128xf32>
    %c114 = arith.constant 114 : index
    %536 = memref.load %arg1[%c114] : memref<133xf32, #tpu.memory_space<smem>>
    %537 = vector.broadcast %536 : f32 to vector<8x128xf32>
    %538 = arith.mulf %436, %537 : vector<8x128xf32>
    %539 = arith.addf %535, %538 : vector<8x128xf32>
    %c118 = arith.constant 118 : index
    %540 = memref.load %arg1[%c118] : memref<133xf32, #tpu.memory_space<smem>>
    %541 = vector.broadcast %540 : f32 to vector<8x128xf32>
    %542 = arith.mulf %442, %541 : vector<8x128xf32>
    %543 = arith.addf %539, %542 : vector<8x128xf32>
    %c122 = arith.constant 122 : index
    %544 = memref.load %arg1[%c122] : memref<133xf32, #tpu.memory_space<smem>>
    %545 = vector.broadcast %544 : f32 to vector<8x128xf32>
    %546 = arith.mulf %448, %545 : vector<8x128xf32>
    %547 = arith.addf %543, %546 : vector<8x128xf32>
    %c126 = arith.constant 126 : index
    %548 = memref.load %arg1[%c126] : memref<133xf32, #tpu.memory_space<smem>>
    %549 = vector.broadcast %548 : f32 to vector<8x128xf32>
    %550 = arith.addf %547, %549 : vector<8x128xf32>
    %c95 = arith.constant 95 : index
    %551 = memref.load %arg1[%c95] : memref<133xf32, #tpu.memory_space<smem>>
    %552 = vector.broadcast %551 : f32 to vector<8x128xf32>
    %553 = arith.mulf %406, %552 : vector<8x128xf32>
    %c99 = arith.constant 99 : index
    %554 = memref.load %arg1[%c99] : memref<133xf32, #tpu.memory_space<smem>>
    %555 = vector.broadcast %554 : f32 to vector<8x128xf32>
    %556 = arith.mulf %412, %555 : vector<8x128xf32>
    %557 = arith.addf %553, %556 : vector<8x128xf32>
    %c103 = arith.constant 103 : index
    %558 = memref.load %arg1[%c103] : memref<133xf32, #tpu.memory_space<smem>>
    %559 = vector.broadcast %558 : f32 to vector<8x128xf32>
    %560 = arith.mulf %418, %559 : vector<8x128xf32>
    %561 = arith.addf %557, %560 : vector<8x128xf32>
    %c107 = arith.constant 107 : index
    %562 = memref.load %arg1[%c107] : memref<133xf32, #tpu.memory_space<smem>>
    %563 = vector.broadcast %562 : f32 to vector<8x128xf32>
    %564 = arith.mulf %424, %563 : vector<8x128xf32>
    %565 = arith.addf %561, %564 : vector<8x128xf32>
    %c111 = arith.constant 111 : index
    %566 = memref.load %arg1[%c111] : memref<133xf32, #tpu.memory_space<smem>>
    %567 = vector.broadcast %566 : f32 to vector<8x128xf32>
    %568 = arith.mulf %430, %567 : vector<8x128xf32>
    %569 = arith.addf %565, %568 : vector<8x128xf32>
    %c115 = arith.constant 115 : index
    %570 = memref.load %arg1[%c115] : memref<133xf32, #tpu.memory_space<smem>>
    %571 = vector.broadcast %570 : f32 to vector<8x128xf32>
    %572 = arith.mulf %436, %571 : vector<8x128xf32>
    %573 = arith.addf %569, %572 : vector<8x128xf32>
    %c119 = arith.constant 119 : index
    %574 = memref.load %arg1[%c119] : memref<133xf32, #tpu.memory_space<smem>>
    %575 = vector.broadcast %574 : f32 to vector<8x128xf32>
    %576 = arith.mulf %442, %575 : vector<8x128xf32>
    %577 = arith.addf %573, %576 : vector<8x128xf32>
    %c123 = arith.constant 123 : index
    %578 = memref.load %arg1[%c123] : memref<133xf32, #tpu.memory_space<smem>>
    %579 = vector.broadcast %578 : f32 to vector<8x128xf32>
    %580 = arith.mulf %448, %579 : vector<8x128xf32>
    %581 = arith.addf %577, %580 : vector<8x128xf32>
    %c127 = arith.constant 127 : index
    %582 = memref.load %arg1[%c127] : memref<133xf32, #tpu.memory_space<smem>>
    %583 = vector.broadcast %582 : f32 to vector<8x128xf32>
    %584 = arith.addf %581, %583 : vector<8x128xf32>
    %cst_41 = arith.constant 0.000000e+00 : f32
    %585 = vector.broadcast %cst_41 : f32 to vector<8x128xf32>
    %586 = arith.maximumf %482, %585 : vector<8x128xf32>
    %cst_42 = arith.constant 0.000000e+00 : f32
    %587 = vector.broadcast %cst_42 : f32 to vector<8x128xf32>
    %588 = arith.maximumf %516, %587 : vector<8x128xf32>
    %cst_43 = arith.constant 0.000000e+00 : f32
    %589 = vector.broadcast %cst_43 : f32 to vector<8x128xf32>
    %590 = arith.maximumf %550, %589 : vector<8x128xf32>
    %cst_44 = arith.constant 0.000000e+00 : f32
    %591 = vector.broadcast %cst_44 : f32 to vector<8x128xf32>
    %592 = arith.maximumf %584, %591 : vector<8x128xf32>
    %c128 = arith.constant 128 : index
    %593 = memref.load %arg1[%c128] : memref<133xf32, #tpu.memory_space<smem>>
    %594 = vector.broadcast %593 : f32 to vector<8x128xf32>
    %595 = arith.mulf %586, %594 : vector<8x128xf32>
    %c129 = arith.constant 129 : index
    %596 = memref.load %arg1[%c129] : memref<133xf32, #tpu.memory_space<smem>>
    %597 = vector.broadcast %596 : f32 to vector<8x128xf32>
    %598 = arith.mulf %588, %597 : vector<8x128xf32>
    %599 = arith.addf %595, %598 : vector<8x128xf32>
    %c130 = arith.constant 130 : index
    %600 = memref.load %arg1[%c130] : memref<133xf32, #tpu.memory_space<smem>>
    %601 = vector.broadcast %600 : f32 to vector<8x128xf32>
    %602 = arith.mulf %590, %601 : vector<8x128xf32>
    %603 = arith.addf %599, %602 : vector<8x128xf32>
    %c131 = arith.constant 131 : index
    %604 = memref.load %arg1[%c131] : memref<133xf32, #tpu.memory_space<smem>>
    %605 = vector.broadcast %604 : f32 to vector<8x128xf32>
    %606 = arith.mulf %592, %605 : vector<8x128xf32>
    %607 = arith.addf %603, %606 : vector<8x128xf32>
    %c132 = arith.constant 132 : index
    %608 = memref.load %arg1[%c132] : memref<133xf32, #tpu.memory_space<smem>>
    %609 = vector.broadcast %608 : f32 to vector<8x128xf32>
    %610 = arith.addf %607, %609 : vector<8x128xf32>
    %cst_45 = arith.constant 0.000000e+00 : f32
    %611 = vector.broadcast %cst_45 : f32 to vector<8x128xf32>
    %612 = arith.maximumf %610, %611 : vector<8x128xf32>
    %c0_46 = arith.constant 0 : index
    %c0_47 = arith.constant 0 : index
    %613 = vector.load %arg3[%c0_46, %c0_47] : memref<8x128xf32, #tpu.memory_space<vmem>>, vector<8x128xf32>
    tpu.vector_store %arg3[%c0_46, %c0_47], %612 {strides = array<i32>} : memref<8x128xf32, #tpu.memory_space<vmem>>, vector<8x128xf32>,
    return
  }
  func.func @transform_0(%arg0: i32) -> i32 {
    %c0_i32 = arith.constant 0 : i32
    %c0_i32_0 = arith.constant 0 : i32
    return %c0_i32 : i32
  }
  func.func @transform_1(%arg0: i32) -> (i32, i32) {
    %c0_i32 = arith.constant 0 : i32
    %c0_i32_0 = arith.constant 0 : i32
    return %arg0, %c0_i32 : i32, i32
  }
  func.func @transform_2(%arg0: i32) -> (i32, i32) {
    %c0_i32 = arith.constant 0 : i32
    %c0_i32_0 = arith.constant 0 : i32
    return %arg0, %c0_i32 : i32, i32
  }
}

</mosaic_0001>

<bundles_post_ra>
// kernel: tpu_custom_call.1
= control target key start
LH: loop header
LB: loop body
LE: loop exit
PB: predicated region body
PF: predicated region fallthrough
CT: control target
= control target key end

     0   :  { %s1870_s0 = inlined_call_operand.hbm [shape: f32[133], index: 0, kind: input, shape index: {}]   ;;  %s1871_s1 = inlined_call_operand.hbm [shape: f32[24,128], index: 1, kind: input, shape index: {}]   ;;  %s1872_s2 = inlined_call_operand.hbm [shape: f32[24,128], index: 2, kind: output, shape index: {}]  }
   0x1   :  { %1893 = sst [smem:[#allocation28_spill]] %s1870_s0 }
   0x2   :  { %1894 = sst [smem:[#allocation29_spill]] %s1871_s1 }
   0x3   :  { %1895 = sst [smem:[#allocation30_spill]] %s1872_s2 }
   0x4   :  { %7 = vsyncpa [#allocation5], 0 }
   0x5   :  { %8 = vsyncpa [#allocation3], 0 }
   0x6   :  { %10 = vsyncpa [#allocation3 + $0x1], 0 }
   0x7   :  { %11 = vsyncpa [#allocation4], 0 }
   0x8   :  { %13 = vsyncpa [#allocation4 + $0x1], 0  ;;  %s1272_s9 = smov 0   ;;  %s1274_s10 = smov 0  }
   0x9   :  { %s1276_s11 = smov 0   ;;  %s1278_s12 = smov 0  }
   0xa LB: > { %1896 = sst [smem:[#allocation11_spill]] %s1240_s9  ;;  %s1293_s13 = sadd.s32 4294967295, %s1252_s12   ;;  %s1252_s12 = sphi %s1278_s12, %s1944_s12   ;;  %s1248_s11 = sphi %s1276_s11, %s1947_s11   ;;  %s1244_s10 = sphi %s1274_s10, %s1946_s10   ;;  %s1240_s9 = sphi %s1272_s9, %s1945_s9  }
   0xb   : > { %1897 = sst [smem:[#allocation12_spill]] %s1244_s10  ;;  %s856_s14 = sadd.s32 4294967294, %s1252_s12  }
   0xc   : > { %1898 = sst [smem:[#allocation13_spill]] %s1248_s11  ;;  %p60_p0 = scmp.ne.s32.totalorder %s1244_s10, %s1240_s9 }
   0xd   : > { %1899 = sst [smem:[#allocation14_spill]] %s1252_s12  ;;  %p1873_p1 = scmp.eq.s32.totalorder %s1293_s13, 0 }
   0xe   : > { %1900 = sst [smem:[#allocation15_spill]] %s1293_s13  ;;  %p90_p3 = scmp.eq.s32.totalorder %s856_s14, 2 }
   0xf   : > { %p1302_p4 = por %p1873_p1, %p60_p0  ;;  %p857_p5 = scmp.ge.s32.totalorder %s1252_s12, 1 }
  0x10   : > { %p1307_p6 = por %p90_p3, %p60_p0  ;;  %p97_p7 = scmp.lt.s32.totalorder %s1252_s12, 4 }
  0x11   : > { %s1901_s15 = scalar_select %p1302_p4, 1, 0 }
  0x12   : > { %s1902_s16 = scalar_select %p1307_p6, 1, 0 }
  0x13   : > { %p1312_p8 = pnand %p857_p5, %p97_p7  ;;  %s1317_s18 = sadd.s32 1, %s1252_s12  }
  0x14   : > { %1903 = sst [smem:[#allocation16_spill]] %s1902_s16  ;;  %s44_s19 = ssub.s32 %s1252_s12, %s1317_s18 }
  0x15   : > { %1905 = sst [smem:[#allocation17_spill]] %s1317_s18  ;;  %p1010_p9 = pneg %p1312_p8 }
  0x16   : > { %s47_s20 = sadd.s32 1, %s1248_s11  ;;  %p1330_p11 = scmp.eq.s32.totalorder %s44_s19, 0 }
  0x17   : > { %p1326_p10 = pnand %p1010_p9, %p1873_p1  ;;  %p54_p12 = scmp.ne.s32.totalorder %s1248_s11, %s1244_s10 }
  0x18   : > { %p55_p13 = scmp.eq.s32.totalorder %s1252_s12, 0  ;;  %p1023_p0 = scmp.lt.s32.totalorder %s1252_s12, 3 }
  0x19   : > { %s1908_s0 = sld [smem:[#allocation28_spill]]  ;;  %p1141_p5 = pneg %p1326_p10 }
  0x1f   : > { %s1139_s25 = scalar_lea.hbm %s1908_s0, 32 }
  0x20   : > { %p1140_p3 = scmp.ne.s32.totalorder %s1908_s0, %s1139_s25  ;;  %p1146_p1 = scmp.lt.u32.totalorder %s1139_s25, %s1908_s0 }
  0x22   : > { %p1142_p7 = pnand %p1141_p5, %p1140_p3 }
  0x24   : > { %p1143_p9 = pneg %p1142_p7 }
  0x26   : > { %p1148_p2 = pnand %p1146_p1, %p1143_p9 }
  0x28   : > { %1151 = shalt.err (!%p1148_p2)
}
  0x29   : > { %s1254_s30 = smov [#allocation2]   ;;  %p56_p1 = por %p55_p13, %p54_p12 }
  0x2a   : > { %1013 = dma.hbm_to_smem (!%p1326_p10), %s1908_s0, 32, %s1254_s30, [#allocation5]  }
  0x2b   : > { %s1357_s5 = scalar_select %p1330_p11, %s1248_s11, %s47_s20  }
  0x2c   : > { %p1910_p2 = scmp.eq.s32.totalorder %s1293_s13, 2  ;;  %s119_s7 = sand.u32 1, %s1248_s11  }
  0x2d   : > { %1909 = sst [smem:[#allocation18_spill]] %s1357_s5  ;;  %s861_s8 = sshll.u32 %s1252_s12, 7 }
  0x2e   : > { %p1369_p3 = por %p1910_p2, %p54_p12  ;;  %s860_s14 = sshll.u32 %s119_s7, 3 }
  0x2f   : > { %s1913_s1 = sld [smem:[#allocation29_spill]]  ;;  %s123_s20 = scalar_lea.vmem [#allocation6], %s860_s14 }
  0x30   : > { %s1911_s6 = scalar_select %p1369_p3, 1, 0 }
  0x31   : > { %s130_s22 = sshll.u32 %s123_s20, 4  ;;  %p1382_p10 = pnand %p1023_p0, %p56_p1  ;;  %s1386_s22 = int_to_ptr.vmem [resolvable:$true] %s130_s22 }
  0x32   : > { %1912 = sst [smem:[#allocation19_spill]] %s1911_s6  ;;  %s120_s25 = scalar_lea.sflag [#allocation3], %s119_s7 }
  0x33   : > { %p1154_p12 = pneg %p1382_p10 }
  0x35   : > { %s1378_s23 = scalar_lea.hbm %s1913_s1, %s861_s8  ;;  %s1157_s29 = scalar_lea.hbm %s1913_s1, 384 }
  0x36   : > { %s1152_s26 = scalar_lea.hbm %s1378_s23, 128  ;;  %p1158_p0 = scmp.lt.u32.totalorder %s1378_s23, %s1913_s1 }
  0x37   : > { %p1153_p11 = scmp.ne.s32.totalorder %s1378_s23, %s1152_s26  ;;  %p1159_p7 = scmp.lt.u32.totalorder %s1157_s29, %s1152_s26 }
  0x38   : > { %p1161_p1 = scmp.lt.u32.totalorder %s1152_s26, %s1378_s23 }
  0x39   : > { %p1155_p13 = pnand %p1154_p12, %p1153_p11  ;;  %p1160_p9 = por %p1159_p7, %p1158_p0 }
  0x3b   : > { %p1156_p5 = pneg %p1155_p13  ;;  %p1162_p2 = por %p1161_p1, %p1160_p9 }
  0x3d   : > { %p1163_p6 = pnand %p1162_p2, %p1156_p5 }
  0x3f   : > { %1166 = shalt.err (!%p1163_p6)
}
  0x40   : > { %s1167_s4 = scalar_lea.vmem %s1386_s22, 128  ;;  %s1255_s7 = smov [#allocation6]  }
  0x41   : > { %p1168_p11 = scmp.ne.s32.totalorder %s1386_s22, %s1167_s4  ;;  %s1172_s8 = sshll.u32 %s1255_s7, 4  ;;  %s1173_s8 = int_to_ptr.vmem [resolvable:$false] %s1172_s8 }
  0x42   : > { %s1174_s14 = scalar_lea.vmem %s1173_s8, 256  ;;  %p1175_p4 = scmp.lt.s32.totalorder %s1386_s22, %s1173_s8 }
  0x43   : > { %p1170_p13 = pnand %p1168_p11, %p1154_p12  ;;  %p1176_p0 = scmp.lt.s32.totalorder %s1174_s14, %s1167_s4 }
  0x45   : > { %p1171_p3 = pneg %p1170_p13  ;;  %p1177_p7 = por %p1176_p0, %p1175_p4 }
  0x47   : > { %p1178_p9 = pnand %p1177_p7, %p1171_p3 }
  0x49   : > { %1181 = shalt.err (!%p1178_p9)
}
  0x4a   : > { %1017 = dma.hbm_to_vmem [thread:$0]  (!%p1382_p10), %s1378_s23, 128, %s1386_s22, %s120_s25  }
  0x4b   : > { %139 = sbr.rel (%p1312_p8) target bundleno = 269 (0x10d), region = 28 }
  0x52   : > { %p1915_p6 = scmp.eq.s32.totalorder %s1293_s13, 0 }
  0x54   : > { %1227 = dma.done.wait (%p1915_p6), [#allocation5], 32   ;;  %p1916_p12 = pmov %p1915_p6 }
  0x55   : > { %s1420_s19 = sand.u32 1, %s1244_s10   ;;  %p1918_p4 = scmp.ne.s32.totalorder %s1901_s15, 0 }
  0x56   : > { %1229 = vsyncadd (%p1916_p12), [#allocation5], 4294967264  ;;  %1917 = sst [smem:[#allocation20_spill]] %s1420_s19  ;;  %s1876_s21 = sshll.u32 %s1420_s19, 3 }
  0x57   : > { %s146_s20 = scalar_lea.sflag [#allocation3], %s1420_s19  ;;  %s149_s23 = scalar_lea.vmem [#allocation6], %s1876_s21 }
  0x58   : > { %1231 = dma.done.wait (%p1918_p4), %s146_s20, 128  }
  0x59   : > { %1233 = vsyncadd (%p1918_p4), %s146_s20, 4294967168 }
  0x5a   : > { %154 = sfence }
  0x5b   : > { %s172_s17 = sld [smem:[#allocation2]]  ;;  %s867_s24 = sld [smem:[#allocation2 + $0x1]]  ;;  %v171_v0 = vld [vmem:[%s149_s23] sm:$0xff] }
  0x5c   : > { %s866_s22 = sld [smem:[#allocation2 + $0x8]]  ;;  %s868_s25 = sld [smem:[#allocation2 + $0x9]] }
  0x5d   : > { %s869_s26 = sld [smem:[#allocation2 + $0x2]]  ;;  %s871_s28 = sld [smem:[#allocation2 + $0x3]] }
  0x5e   : > { %s870_s27 = sld [smem:[#allocation2 + $0xa]]  ;;  %s872_s29 = sld [smem:[#allocation2 + $0xb]] }
  0x5f   : > { %s873_s30 = sld [smem:[#allocation2 + $0x4]]  ;;  %s875_s4 = sld [smem:[#allocation2 + $0x5]] }
  0x60   : > { %s1430_s3 = sld [smem:[#allocation2 + $0xc]]  ;;  %s1432_s7 = sld [smem:[#allocation2 + $0xd]] }
  0x61   : > { %v173_v1 = vstv %s172_s17  ;;  %s877_s8 = sld [smem:[#allocation2 + $0x6]]  ;;  %v179_v4 = vstv %s867_s24  ;;  %s879_s14 = sld [smem:[#allocation2 + $0x7]] }
  0x62   : > { %v174_v2 = vmul.f32 %v173_v1, %v171_v0  ;;  %v176_v3 = vstv %s866_s22  ;;  %s878_s15 = sld [smem:[#allocation2 + $0xe]]  ;;  %v180_v5 = vmul.f32 %v179_v4, %v171_v0  ;;  %v182_v6 = vstv %s868_s25  ;;  %s880_s20 = sld [smem:[#allocation2 + $0xf]] }
  0x63   : > { %v185_v7 = vstv %s869_s26  ;;  %v191_v11 = vstv %s871_s28  ;;  %s1436_s23 = sld [smem:[#allocation2 + $0x10]]  ;;  %s1438_s17 = sld [smem:[#allocation2 + $0x14]] }
  0x64   : > { %v177_v8 = vadd.f32 %v176_v3, %v174_v2  ;;  %v186_v9 = vmul.f32 %v185_v7, %v171_v0  ;;  %v188_v10 = vstv %s870_s27  ;;  %v183_v12 = vadd.f32 %v182_v6, %v180_v5  ;;  %s1440_s22 = sld [smem:[#allocation2 + $0x18]]  ;;  %s1442_s24 = sld [smem:[#allocation2 + $0x1c]] }
  0x65   : > { %v192_v13 = vmul.f32 %v191_v11, %v171_v0  ;;  %v194_v14 = vstv %s872_s29  ;;  %v197_v15 = vstv %s873_s30  ;;  %v203_v19 = vstv %s875_s4  ;;  %s1444_s25 = sld [smem:[#allocation2 + $0x20]]  ;;  %s1446_s26 = sld [smem:[#allocation2 + $0x24]] }
  0x66   : > { %v189_v16 = vadd.f32 %v188_v10, %v186_v9  ;;  %v198_v17 = vmul.f32 %v197_v15, %v171_v0  ;;  %v200_v18 = vstv %s1430_s3  ;;  %v204_v21 = vmul.f32 %v203_v19, %v171_v0  ;;  %s1448_s27 = sld [smem:[#allocation2 + $0x28]]  ;;  %s1450_s28 = sld [smem:[#allocation2 + $0x2c]] }
  0x67   : > { %v195_v20 = vadd.f32 %v194_v14, %v192_v13  ;;  %v206_v22 = vstv %s1432_s7  ;;  %v209_v23 = vstv %s877_s8  ;;  %v215_v27 = vstv %s879_s14  ;;  %s1452_s29 = sld [smem:[#allocation2 + $0x11]]  ;;  %s1454_s30 = sld [smem:[#allocation2 + $0x15]] }
  0x68   : > { %v201_v24 = vadd.f32 %v200_v18, %v198_v17  ;;  %v210_v25 = vmul.f32 %v209_v23, %v171_v0  ;;  %v212_v26 = vstv %s878_s15  ;;  %v207_v28 = vadd.f32 %v206_v22, %v204_v21  ;;  %s1456_s3 = sld [smem:[#allocation2 + $0x19]]  ;;  %s1458_s4 = sld [smem:[#allocation2 + $0x1d]] }
  0x69   : > { %v216_v29 = vmul.f32 %v215_v27, %v171_v0  ;;  %v218_v30 = vstv %s880_s20  ;;  %v220_v31 = vsub.f32 0.0, %v177_v8  ;;  %v225_v33 = vsub.f32 0.0, %v183_v12  ;;  %s1460_s7 = sld [smem:[#allocation2 + $0x21]]  ;;  %s1462_s8 = sld [smem:[#allocation2 + $0x25]] }
  0x6a   : > { %v213_v32 = vadd.f32 %v212_v26, %v210_v25  ;;  %v230_v34 = vsub.f32 0.0, %v189_v16  ;;  %v235_v35 = vsub.f32 0.0, %v195_v20  ;;  %v240_v38 = vsub.f32 0.0, %v201_v24  ;;  %s1464_s15 = sld [smem:[#allocation2 + $0x29]]  ;;  %s1466_s14 = sld [smem:[#allocation2 + $0x2d]] }
  0x6b   : > { %v219_v36 = vadd.f32 %v218_v30, %v216_v29  ;;  %v221_v37 = vmul.f32 1.442695, %v220_v31  ;;  %v245_v39 = vsub.f32 0.0, %v207_v28  ;;  %v226_v40 = vmul.f32 1.442695, %v225_v33  ;;  %s1468_s20 = sld [smem:[#allocation2 + $0x12]] }
  0x6c   : > { %v231_v41 = vmul.f32 1.442695, %v230_v34  ;;  %v236_v42 = vmul.f32 1.442695, %v235_v35  ;;  %v241_v43 = vmul.f32 1.442695, %v240_v38  ;;  %v261_v60 = vstv %s1436_s23 }
  0x6d   : > { %1059 = vpow2.f32 %v221_v37  ;;  %v250_v44 = vsub.f32 0.0, %v213_v32  ;;  %v246_v45 = vmul.f32 1.442695, %v245_v39  ;;  %v255_v46 = vsub.f32 0.0, %v219_v36  ;;  %s1470_s21 = sld [smem:[#allocation2 + $0x16]]  ;;  %s1472_s0 = sld [smem:[#allocation2 + $0x1a]] }
  0x6e   : > { %1061 = vpow2.f32 %v226_v40  ;;  %s1474_s1 = sld [smem:[#allocation2 + $0x1e]]  ;;  %s1476_s5 = sld [smem:[#allocation2 + $0x22]]  ;;  %v264_v61 = vstv %s1438_s17  ;;  %v268_v0 = vstv %s1440_s22  ;;  %v272_v1 = vstv %s1442_s24 }
  0x6f   : > { %1063 = vpow2.f32 %v231_v41  ;;  %v251_v47 = vmul.f32 1.442695, %v250_v44  ;;  %v256_v48 = vmul.f32 1.442695, %v255_v46  ;;  %s1478_s11 = sld [smem:[#allocation2 + $0x26]]  ;;  %s1480_s10 = sld [smem:[#allocation2 + $0x2a]]  ;;  %v276_v4 = vstv %s1444_s25 }
  0x70   : > { %1065 = vpow2.f32 %v236_v42  ;;  %s1482_s18 = sld [smem:[#allocation2 + $0x2e]]  ;;  %s1486_s16 = sld [smem:[#allocation2 + $0x13]]  ;;  %v280_v5 = vstv %s1446_s26  ;;  %v284_v7 = vstv %s1448_s27  ;;  %v288_v8 = vstv %s1450_s28 }
  0x71   : > { %1067 = vpow2.f32 %v241_v43  ;;  %s1488_s9 = sld [smem:[#allocation2 + $0x17]]  ;;  %s1492_s12 = sld [smem:[#allocation2 + $0x1b]]  ;;  %v295_v9 = vstv %s1452_s29  ;;  %v298_v10 = vstv %s1454_s30  ;;  %v302_v11 = vstv %s1456_s3 }
  0x72   : > { %1069 = vpow2.f32 %v246_v45  ;;  %s1496_s23 = sld [smem:[#allocation2 + $0x1f]]  ;;  %s1500_s17 = sld [smem:[#allocation2 + $0x23]]  ;;  %v306_v12 = vstv %s1458_s4  ;;  %v310_v13 = vstv %s1460_s7  ;;  %v314_v14 = vstv %s1462_s8 }
  0x73   : > { %1071 = vpow2.f32 %v251_v47  ;;  %v318_v15 = vstv %s1464_s15  ;;  %v322_v16 = vstv %s1466_s14  ;;  %v329_v17 = vstv %s1468_s20  ;;  %s1516_s22 = sld [smem:[#allocation2 + $0x27]]  ;;  %s1562_s24 = sld [smem:[#allocation2 + $0x54]] }
  0x74   : > { %1073 = vpow2.f32 %v256_v48  ;;  %v332_v18 = vstv %s1470_s21  ;;  %v336_v19 = vstv %s1472_s0  ;;  %v340_v20 = vstv %s1474_s1  ;;  %s1525_s0 = sld [smem:[#allocation2 + $0x30]]  ;;  %s1527_s1 = sld [smem:[#allocation2 + $0x2b]] }
  0x75   : > { %v344_v21 = vstv %s1476_s5  ;;  %v348_v22 = vstv %s1478_s11  ;;  %v352_v24 = vstv %s1480_s10  ;;  %s1531_s10 = sld [smem:[#allocation2 + $0x32]]  ;;  %s1534_s11 = sld [smem:[#allocation2 + $0x2f]] }
  0x76   : > { %v356_v25 = vstv %s1482_s18  ;;  %v363_v26 = vstv %s1486_s16  ;;  %s1553_s16 = sld [smem:[#allocation2 + $0x34]]  ;;  %s1564_s25 = sld [smem:[#allocation2 + $0x35]] }
  0x77   : > { %v1060_v49 = vpop.eup %1059  ;;  %v366_v27 = vstv %s1488_s9  ;;  %v370_v32 = vstv %s1492_s12  ;;  %s1529_s9 = sld [smem:[#allocation2 + $0x31]]  ;;  %s1548_s12 = sld [smem:[#allocation2 + $0x33]] }
  0x78   : > { %v1062_v50 = vpop.eup %1061  ;;  %v223_v51 = vadd.f32 1.0, %v1060_v49  ;;  %v374_v37 = vstv %s1496_s23  ;;  %v378_v42 = vstv %s1500_s17  ;;  %s1555_s18 = sld [smem:[#allocation2 + $0x3c]]  ;;  %s1566_s26 = sld [smem:[#allocation2 + $0x3d]] }
  0x79   : > { %v1064_v52 = vpop.eup %1063  ;;  %v228_v53 = vadd.f32 1.0, %v1062_v50  ;;  %s1558_s5 = sld [smem:[#allocation2 + $0x44]]  ;;  %1919 = sst [smem:[#allocation21_spill]] %s1562_s24 }
  0x7a   : > { %v1066_v54 = vpop.eup %1065  ;;  %1075 = vrcp.f32 %v223_v51  ;;  %v233_v55 = vadd.f32 1.0, %v1064_v52  ;;  %s1560_s21 = sld [smem:[#allocation2 + $0x4c]]  ;;  %s1568_s27 = sld [smem:[#allocation2 + $0x45]] }
  0x7b   : > { %v1068_v56 = vpop.eup %1067  ;;  %1077 = vrcp.f32 %v228_v53  ;;  %v238_v57 = vadd.f32 1.0, %v1066_v54  ;;  %s1570_s28 = sld [smem:[#allocation2 + $0x4d]]  ;;  %s1574_s30 = sld [smem:[#allocation2 + $0x36]] }
  0x7c   : > { %v1070_v58 = vpop.eup %1069  ;;  %1079 = vrcp.f32 %v233_v55  ;;  %v243_v59 = vadd.f32 1.0, %v1068_v56  ;;  %s1572_s29 = sld [smem:[#allocation2 + $0x55]]  ;;  %s1576_s3 = sld [smem:[#allocation2 + $0x3e]] }
  0x7d   : > { %v1072_v62 = vpop.eup %1071  ;;  %1081 = vrcp.f32 %v238_v57  ;;  %v248_v63 = vadd.f32 1.0, %v1070_v58  ;;  %s1578_s4 = sld [smem:[#allocation2 + $0x46]]  ;;  %s1584_s15 = sld [smem:[#allocation2 + $0x37]] }
  0x7e   : > { %v1074_v2 = vpop.eup %1073  ;;  %1083 = vrcp.f32 %v243_v59  ;;  %v253_v3 = vadd.f32 1.0, %v1072_v62  ;;  %s1580_s7 = sld [smem:[#allocation2 + $0x4e]]  ;;  %s1586_s14 = sld [smem:[#allocation2 + $0x3f]] }
  0x7f   : > { %1085 = vrcp.f32 %v248_v63  ;;  %v258_v6 = vadd.f32 1.0, %v1074_v2  ;;  %s1582_s8 = sld [smem:[#allocation2 + $0x56]]  ;;  %s1588_s20 = sld [smem:[#allocation2 + $0x47]] }
  0x80   : > { %1087 = vrcp.f32 %v253_v3  ;;  %s1590_s23 = sld [smem:[#allocation2 + $0x4f]]  ;;  %s1608_s2 = sld [smem:[#allocation2 + $0x49]] }
  0x81   : > { %1089 = vrcp.f32 %v258_v6  ;;  %1920 = sst [smem:[#allocation22_spill]] %s1570_s28  ;;  %s1592_s17 = sld [smem:[#allocation2 + $0x57]] }
  0x82   : > { %s1610_s6 = sld [smem:[#allocation2 + $0x51]]  ;;  %s1614_s13 = sld [smem:[#allocation2 + $0x3a]] }
  0x83   : > { %s1612_s19 = sld [smem:[#allocation2 + $0x59]] }
  0x84   : > { %v1076_v23 = vpop.eup %1075 }
  0x85   : > { %v1078_v28 = vpop.eup %1077  ;;  %v262_v29 = vmul.f32 %v1076_v23, %v261_v60  ;;  %v296_v30 = vmul.f32 %v1076_v23, %v295_v9  ;;  %v330_v31 = vmul.f32 %v1076_v23, %v329_v17  ;;  %v364_v51 = vmul.f32 %v1076_v23, %v363_v26 }
  0x86   : > { %v1080_v33 = vpop.eup %1079  ;;  %v265_v34 = vmul.f32 %v1078_v28, %v264_v61  ;;  %v299_v35 = vmul.f32 %v1078_v28, %v298_v10  ;;  %v333_v36 = vmul.f32 %v1078_v28, %v332_v18  ;;  %v367_v52 = vmul.f32 %v1078_v28, %v366_v27 }
  0x87   : > { %v1082_v38 = vpop.eup %1081  ;;  %v269_v39 = vmul.f32 %v1080_v33, %v268_v0  ;;  %v303_v40 = vmul.f32 %v1080_v33, %v302_v11  ;;  %v337_v41 = vmul.f32 %v1080_v33, %v336_v19  ;;  %v371_v60 = vmul.f32 %v1080_v33, %v370_v32 }
  0x88   : > { %v1084_v43 = vpop.eup %1083  ;;  %v266_v44 = vadd.f32 %v265_v34, %v262_v29  ;;  %v273_v45 = vmul.f32 %v1082_v38, %v272_v1  ;;  %v300_v46 = vadd.f32 %v299_v35, %v296_v30  ;;  %v307_v47 = vmul.f32 %v1082_v38, %v306_v12  ;;  %1923 = sst [smem:[#allocation25_spill]] %s1610_s6  ;;  %s1623_s6 = sld [smem:[#allocation2 + $0x52]] }
  0x89   : > { %v1086_v48 = vpop.eup %1085  ;;  %v334_v49 = vadd.f32 %v333_v36, %v330_v31  ;;  %v341_v50 = vmul.f32 %v1082_v38, %v340_v20  ;;  %v277_v55 = vmul.f32 %v1084_v43, %v276_v4  ;;  %v311_v57 = vmul.f32 %v1084_v43, %v310_v13  ;;  %1924 = sst [smem:[#allocation26_spill]] %s1612_s19  ;;  %s1625_s19 = sld [smem:[#allocation2 + $0x5a]] }
  0x8a   : > { %v1088_v53 = vpop.eup %1087  ;;  %v270_v54 = vadd.f32 %v269_v39, %v266_v44  ;;  %v304_v56 = vadd.f32 %v303_v40, %v300_v46  ;;  %v345_v59 = vmul.f32 %v1084_v43, %v344_v21  ;;  %v382_v61 = vstv %s1516_s22  ;;  %s1594_s22 = sld [smem:[#allocation2 + $0x38]] }
  0x8b   : > { %v338_v58 = vadd.f32 %v337_v41, %v334_v49  ;;  %v1090_v62 = vpop.eup %1089  ;;  %v281_v0 = vmul.f32 %v1086_v48, %v280_v5  ;;  %v315_v2 = vmul.f32 %v1086_v48, %v314_v14  ;;  %v285_v3 = vmul.f32 %v1088_v53, %v284_v7 }
  0x8c   : > { %v274_v63 = vadd.f32 %v273_v45, %v270_v54  ;;  %v308_v1 = vadd.f32 %v307_v47, %v304_v56  ;;  %v319_v4 = vmul.f32 %v1088_v53, %v318_v15  ;;  %v349_v9 = vmul.f32 %v1086_v48, %v348_v22 }
  0x8d   : > { %v342_v6 = vadd.f32 %v341_v50, %v338_v58  ;;  %v368_v12 = vadd.f32 %v367_v52, %v364_v51  ;;  %v375_v13 = vmul.f32 %v1082_v38, %v374_v37  ;;  %v289_v17 = vmul.f32 %v1090_v62, %v288_v8 }
  0x8e   : > { %v278_v10 = vadd.f32 %v277_v55, %v274_v63  ;;  %v312_v11 = vadd.f32 %v311_v57, %v308_v1  ;;  %v323_v18 = vmul.f32 %v1090_v62, %v322_v16  ;;  %v353_v19 = vmul.f32 %v1088_v53, %v352_v24 }
  0x8f   : > { %v346_v5 = vadd.f32 %v345_v59, %v342_v6  ;;  %v372_v15 = vadd.f32 %v371_v60, %v368_v12  ;;  %v379_v20 = vmul.f32 %v1084_v43, %v378_v42  ;;  %v292_v21 = vstv %s1525_s0  ;;  %s1596_s0 = sld [smem:[#allocation2 + $0x40]] }
  0x90   : > { %v282_v14 = vadd.f32 %v281_v0, %v278_v10  ;;  %v316_v7 = vadd.f32 %v315_v2, %v312_v11  ;;  %v357_v23 = vmul.f32 %v1090_v62, %v356_v25  ;;  %v386_v26 = vstv %s1527_s1  ;;  %s1598_s1 = sld [smem:[#allocation2 + $0x48]] }
  0x91   : > { %v350_v22 = vadd.f32 %v349_v9, %v346_v5  ;;  %v376_v28 = vadd.f32 %v375_v13, %v372_v15  ;;  %v383_v16 = vmul.f32 %v1086_v48, %v382_v61  ;;  %v326_v29 = vstv %s1529_s9  ;;  %s1600_s9 = sld [smem:[#allocation2 + $0x50]] }
  0x92   : > { %v286_v27 = vadd.f32 %v285_v3, %v282_v14  ;;  %v320_v8 = vadd.f32 %v319_v4, %v316_v7  ;;  %v360_v24 = vstv %s1531_s10  ;;  %v390_v31 = vstv %s1534_s11  ;;  %s1602_s10 = sld [smem:[#allocation2 + $0x58]]  ;;  %s1604_s11 = sld [smem:[#allocation2 + $0x39]] }
  0x93   : > { %v354_v30 = vadd.f32 %v353_v19, %v350_v22  ;;  %v380_v34 = vadd.f32 %v379_v20, %v376_v28  ;;  %v387_v35 = vmul.f32 %v1088_v53, %v386_v26  ;;  %v391_v39 = vmul.f32 %v1090_v62, %v390_v31 }
  0x94   : > { %v290_v32 = vadd.f32 %v289_v17, %v286_v27  ;;  %v324_v33 = vadd.f32 %v323_v18, %v320_v8  ;;  %v394_v44 = vstv %s1548_s12  ;;  %s1606_s12 = sld [smem:[#allocation2 + $0x41]]  ;;  %v417_v58 = vstv %s1553_s16  ;;  %s1630_s16 = sld [smem:[#allocation2 + $0x3b]] }
  0x95   : > { %v358_v36 = vadd.f32 %v357_v23, %v354_v30  ;;  %v384_v25 = vadd.f32 %v383_v16, %v380_v34  ;;  %v420_v60 = vstv %s1555_s18  ;;  %v424_v61 = vstv %s1558_s5  ;;  %s1637_s18 = sld [smem:[#allocation2 + $0x4b]] }
  0x96   : > { %v293_v37 = vadd.f32 %v292_v21, %v290_v32  ;;  %v327_v38 = vadd.f32 %v326_v29, %v324_v33  ;;  %v428_v62 = vstv %s1560_s21  ;;  %v432_v63 = vstv %s1562_s24  ;;  %s1639_s5 = sld [smem:[#allocation2 + $0x53]]  ;;  %s1929_s24 = sld [smem:[#allocation26_spill]] }
  0x97   : > { %v361_v40 = vadd.f32 %v360_v24, %v358_v36  ;;  %v388_v41 = vadd.f32 %v387_v35, %v384_v25  ;;  %v435_v0 = vstv %s1564_s25  ;;  %v438_v1 = vstv %s1566_s26  ;;  %s1692_s21 = sld [smem:[#allocation2 + $0x5c]] }
  0x98   : > { %v396_v42 = vsub.f32 0.0, %v293_v37  ;;  %v401_v43 = vsub.f32 0.0, %v327_v38  ;;  %1921 = sst [smem:[#allocation23_spill]] %s1604_s11  ;;  %s1619_s11 = sld [smem:[#allocation2 + $0x4a]]  ;;  %v442_v2 = vstv %s1568_s27  ;;  %v446_v3 = vstv %s1570_s28 }
  0x99   : > { %v406_v45 = vsub.f32 0.0, %v361_v40  ;;  %v392_v46 = vadd.f32 %v391_v39, %v388_v41  ;;  %v450_v6 = vstv %s1572_s29  ;;  %v453_v9 = vstv %s1574_s30  ;;  %s1926_s25 = sld [smem:[#allocation23_spill]]  ;;  %s1928_s27 = sld [smem:[#allocation25_spill]] }
  0x9a   : > { %v397_v47 = vmul.f32 1.442695, %v396_v42  ;;  %v402_v48 = vmul.f32 1.442695, %v401_v43  ;;  %1922 = sst [smem:[#allocation24_spill]] %s1606_s12  ;;  %s1617_s12 = sld [smem:[#allocation2 + $0x42]]  ;;  %v456_v10 = vstv %s1576_s3  ;;  %v460_v11 = vstv %s1578_s4 }
  0x9b   : > { %v407_v49 = vmul.f32 1.442695, %v406_v45  ;;  %v395_v50 = vadd.f32 %v394_v44, %v392_v46  ;;  %s1927_s26 = sld [smem:[#allocation24_spill]]  ;;  %v464_v13 = vstv %s1580_s7  ;;  %v468_v17 = vstv %s1582_s8  ;;  %s1698_s29 = sld [smem:[#allocation2 + $0x68]] }
  0x9c   : > { %1091 = vpow2.f32 %v397_v47  ;;  %v471_v18 = vstv %s1584_s15  ;;  %v474_v5 = vstv %s1586_s14  ;;  %v478_v19 = vstv %s1588_s20  ;;  %s1700_s30 = sld [smem:[#allocation2 + $0x6c]]  ;;  %s1706_s4 = sld [smem:[#allocation2 + $0x78]] }
  0x9d   : > { %1093 = vpow2.f32 %v402_v48  ;;  %v411_v51 = vsub.f32 0.0, %v395_v50  ;;  %v482_v14 = vstv %s1590_s23  ;;  %v486_v7 = vstv %s1592_s17  ;;  %s1704_s3 = sld [smem:[#allocation2 + $0x74]]  ;;  %s1708_s7 = sld [smem:[#allocation2 + $0x5d]] }
  0x9e   : > { %1095 = vpow2.f32 %v407_v49  ;;  %1925 = sst [smem:[#allocation27_spill]] %s1619_s11  ;;  %s1632_s11 = sld [smem:[#allocation2 + $0x43]]  ;;  %v489_v15 = vstv %s1594_s22  ;;  %v492_v20 = vstv %s1596_s0  ;;  %v496_v21 = vstv %s1598_s1 }
  0x9f   : > { %v412_v52 = vmul.f32 1.442695, %v411_v51  ;;  %s1930_s28 = sld [smem:[#allocation27_spill]]  ;;  %v500_v22 = vstv %s1600_s9  ;;  %v504_v23 = vstv %s1602_s10  ;;  %v507_v26 = vstv %s1926_s25  ;;  %s1710_s8 = sld [smem:[#allocation2 + $0x61]] }
  0xa0   : > { %v514_v8 = vstv %s1608_s2  ;;  %v518_v28 = vstv %s1928_s27  ;;  %v522_v16 = vstv %s1929_s24  ;;  %v525_v29 = vstv %s1614_s13  ;;  %s1694_s24 = sld [smem:[#allocation2 + $0x60]]  ;;  %s1712_s15 = sld [smem:[#allocation2 + $0x65]] }
  0xa1   : > { %1097 = vpow2.f32 %v412_v52  ;;  %v510_v27 = vstv %s1927_s26  ;;  %v528_v30 = vstv %s1617_s12  ;;  %v536_v31 = vstv %s1623_s6  ;;  %s1675_s6 = sld [smem:[#allocation2 + $0x5b]]  ;;  %s1714_s14 = sld [smem:[#allocation2 + $0x69]] }
  0xa2   : > { %v540_v32 = vstv %s1625_s19  ;;  %v543_v34 = vstv %s1630_s16  ;;  %v550_v36 = vstv %s1637_s18  ;;  %v554_v37 = vstv %s1639_s5  ;;  %s1702_s19 = sld [smem:[#allocation2 + $0x70]]  ;;  %s1716_s20 = sld [smem:[#allocation2 + $0x6d]] }
  0xa3   : > { %s1718_s23 = sld [smem:[#allocation2 + $0x71]]  ;;  %s1720_s17 = sld [smem:[#allocation2 + $0x75]] }
  0xa4   : > { %v546_v35 = vstv %s1632_s11  ;;  %s1722_s22 = sld [smem:[#allocation2 + $0x79]]  ;;  %s1724_s0 = sld [smem:[#allocation2 + $0x5e]] }
  0xa5   : > { %v532_v24 = vstv %s1930_s28  ;;  %s1696_s28 = sld [smem:[#allocation2 + $0x64]]  ;;  %s1726_s1 = sld [smem:[#allocation2 + $0x62]] }
  0xa6   : > { %v1092_v53 = vpop.eup %1091  ;;  %s1728_s9 = sld [smem:[#allocation2 + $0x66]]  ;;  %s1730_s10 = sld [smem:[#allocation2 + $0x6a]] }
  0xa7   : > { %v1094_v54 = vpop.eup %1093  ;;  %v399_v55 = vadd.f32 1.0, %v1092_v53  ;;  %s1732_s11 = sld [smem:[#allocation2 + $0x6e]]  ;;  %s1734_s12 = sld [smem:[#allocation2 + $0x72]] }
  0xa8   : > { %v1096_v56 = vpop.eup %1095  ;;  %v404_v57 = vadd.f32 1.0, %v1094_v54  ;;  %s1736_s16 = sld [smem:[#allocation2 + $0x76]]  ;;  %s1739_s18 = sld [smem:[#allocation2 + $0x7a]] }
  0xa9   : > { %1099 = vrcp.f32 %v399_v55  ;;  %v409_v59 = vadd.f32 1.0, %v1096_v56  ;;  %s1741_s5 = sld [smem:[#allocation2 + $0x5f]]  ;;  %s1745_s25 = sld [smem:[#allocation2 + $0x63]] }
  0xaa   : > { %1101 = vrcp.f32 %v404_v57  ;;  %s1747_s26 = sld [smem:[#allocation2 + $0x67]]  ;;  %s1751_s27 = sld [smem:[#allocation2 + $0x6b]] }
  0xab   : > { %1103 = vrcp.f32 %v409_v59  ;;  %v1098_v4 = vpop.eup %1097  ;;  %s1764_s2 = sld [smem:[#allocation2 + $0x6f]]  ;;  %s1773_s13 = sld [smem:[#allocation2 + $0x73]] }
  0xac   : > { %v414_v12 = vadd.f32 1.0, %v1098_v4 }
  0xae   : > { %1105 = vrcp.f32 %v414_v12 }
  0xb3   : > { %v1100_v33 = vpop.eup %1099 }
  0xb4   : > { %v1102_v38 = vpop.eup %1101  ;;  %v418_v25 = vmul.f32 %v1100_v33, %v417_v58  ;;  %v436_v39 = vmul.f32 %v1100_v33, %v435_v0  ;;  %v454_v40 = vmul.f32 %v1100_v33, %v453_v9  ;;  %v472_v41 = vmul.f32 %v1100_v33, %v471_v18 }
  0xb5   : > { %v1104_v42 = vpop.eup %1103  ;;  %v421_v43 = vmul.f32 %v1102_v38, %v420_v60  ;;  %v439_v44 = vmul.f32 %v1102_v38, %v438_v1  ;;  %v457_v45 = vmul.f32 %v1102_v38, %v456_v10  ;;  %v475_v46 = vmul.f32 %v1102_v38, %v474_v5 }
  0xb6   : > { %v425_v47 = vmul.f32 %v1104_v42, %v424_v61  ;;  %v443_v48 = vmul.f32 %v1104_v42, %v442_v2  ;;  %v461_v49 = vmul.f32 %v1104_v42, %v460_v11  ;;  %v479_v50 = vmul.f32 %v1104_v42, %v478_v19 }
  0xb7   : > { %v422_v51 = vadd.f32 %v421_v43, %v418_v25  ;;  %v440_v52 = vadd.f32 %v439_v44, %v436_v39  ;;  %v458_v53 = vadd.f32 %v457_v45, %v454_v40  ;;  %v476_v54 = vadd.f32 %v475_v46, %v472_v41 }
  0xb8   : > { %v490_v55 = vmul.f32 %v1100_v33, %v489_v15  ;;  %v493_v56 = vmul.f32 %v1102_v38, %v492_v20  ;;  %v497_v57 = vmul.f32 %v1104_v42, %v496_v21  ;;  %v508_v58 = vmul.f32 %v1100_v33, %v507_v26  ;;  %v1106_v59 = vpop.eup %1105 }
  0xb9   : > { %v426_v0 = vadd.f32 %v425_v47, %v422_v51  ;;  %v444_v60 = vadd.f32 %v443_v48, %v440_v52  ;;  %v462_v1 = vadd.f32 %v461_v49, %v458_v53  ;;  %v480_v4 = vadd.f32 %v479_v50, %v476_v54 }
  0xba   : > { %v429_v61 = vmul.f32 %v1106_v59, %v428_v62  ;;  %v447_v2 = vmul.f32 %v1106_v59, %v446_v3  ;;  %v465_v9 = vmul.f32 %v1106_v59, %v464_v13  ;;  %v483_v10 = vmul.f32 %v1106_v59, %v482_v14 }
  0xbb   : > { %v494_v11 = vadd.f32 %v493_v56, %v490_v55  ;;  %v501_v12 = vmul.f32 %v1106_v59, %v500_v22  ;;  %v511_v18 = vmul.f32 %v1102_v38, %v510_v27  ;;  %v515_v5 = vmul.f32 %v1104_v42, %v514_v8 }
  0xbc   : > { %v430_v19 = vadd.f32 %v429_v61, %v426_v0  ;;  %v448_v15 = vadd.f32 %v447_v2, %v444_v60  ;;  %v466_v20 = vadd.f32 %v465_v9, %v462_v1  ;;  %v484_v21 = vadd.f32 %v483_v10, %v480_v4 }
  0xbd   : > { %v498_v26 = vadd.f32 %v497_v57, %v494_v11  ;;  %v512_v25 = vadd.f32 %v511_v18, %v508_v58  ;;  %v519_v62 = vmul.f32 %v1106_v59, %v518_v28  ;;  %v526_v39 = vmul.f32 %v1100_v33, %v525_v29 }
  0xbe   : > { %v433_v3 = vadd.f32 %v432_v63, %v430_v19  ;;  %v451_v13 = vadd.f32 %v450_v6, %v448_v15  ;;  %v469_v14 = vadd.f32 %v468_v17, %v466_v20  ;;  %v487_v22 = vadd.f32 %v486_v7, %v484_v21 }
  0xbf   : > { %v502_v27 = vadd.f32 %v501_v12, %v498_v26  ;;  %v516_v8 = vadd.f32 %v515_v5, %v512_v25  ;;  %v529_v40 = vmul.f32 %v1102_v38, %v528_v30  ;;  %v533_v41 = vmul.f32 %v1104_v42, %v532_v24 }
  0xc0   : > { %v537_v43 = vmul.f32 %v1106_v59, %v536_v31  ;;  %v544_v44 = vmul.f32 %v1100_v33, %v543_v34  ;;  %v547_v45 = vmul.f32 %v1102_v38, %v546_v35  ;;  %v551_v28 = vmul.f32 %v1104_v42, %v550_v36 }
  0xc1   : > { %v505_v29 = vadd.f32 %v504_v23, %v502_v27  ;;  %v520_v46 = vadd.f32 %v519_v62, %v516_v8  ;;  %v530_v63 = vadd.f32 %v529_v40, %v526_v39  ;;  %v555_v47 = vmul.f32 %v1106_v59, %v554_v37 }
  0xc2   : > { %v548_v6 = vadd.f32 %v547_v45, %v544_v44  ;;  %v560_v48 = vsub.f32 0.0, %v433_v3  ;;  %v565_v17 = vsub.f32 0.0, %v451_v13  ;;  %v570_v49 = vsub.f32 0.0, %v469_v14 }
  0xc3   : > { %v523_v7 = vadd.f32 %v522_v16, %v520_v46  ;;  %v534_v50 = vadd.f32 %v533_v41, %v530_v63  ;;  %v575_v30 = vsub.f32 0.0, %v487_v22  ;;  %v580_v24 = vsub.f32 0.0, %v505_v29 }
  0xc4   : > { %v552_v31 = vadd.f32 %v551_v28, %v548_v6  ;;  %v561_v33 = vmul.f32 1.442695, %v560_v48  ;;  %v566_v34 = vmul.f32 1.442695, %v565_v17  ;;  %v571_v35 = vmul.f32 1.442695, %v570_v49 }
  0xc5   : > { %v538_v36 = vadd.f32 %v537_v43, %v534_v50  ;;  %v558_v23 = vstv %s1675_s6  ;;  %v576_v38 = vmul.f32 1.442695, %v575_v30  ;;  %v585_v42 = vsub.f32 0.0, %v523_v7  ;;  %s1780_s6 = sld [smem:[#allocation2 + $0x77]] }
  0xc6   : > { %v556_v51 = vadd.f32 %v555_v47, %v552_v31  ;;  %1107 = vpow2.f32 %v561_v33  ;;  %v581_v37 = vmul.f32 1.442695, %v580_v24  ;;  %v601_v9 = vstv %s1692_s21  ;;  %s1783_s21 = sld [smem:[#allocation2 + $0x7c]] }
  0xc7   : > { %v541_v52 = vadd.f32 %v540_v32, %v538_v36  ;;  %1109 = vpow2.f32 %v566_v34  ;;  %v586_v53 = vmul.f32 1.442695, %v585_v42  ;;  %v604_v12 = vstv %s1694_s24  ;;  %s1785_s24 = sld [smem:[#allocation2 + $0x7b]] }
  0xc8   : > { %v559_v54 = vadd.f32 %v558_v23, %v556_v51  ;;  %1111 = vpow2.f32 %v571_v35  ;;  %v608_v18 = vstv %s1696_s28  ;;  %v612_v19 = vstv %s1698_s29  ;;  %s1787_s28 = sld [smem:[#allocation2 + $0x7d]]  ;;  %s1792_s29 = sld [smem:[#allocation2 + $0x7e]] }
  0xc9   : > { %1113 = vpow2.f32 %v576_v38  ;;  %v590_v16 = vsub.f32 0.0, %v541_v52  ;;  %v616_v15 = vstv %s1700_s30  ;;  %v620_v21 = vstv %s1702_s19  ;;  %s1799_s30 = sld [smem:[#allocation2 + $0x80]]  ;;  %s1801_s19 = sld [smem:[#allocation2 + $0x81]] }
  0xca   : > { %1115 = vpow2.f32 %v581_v37  ;;  %v595_v55 = vsub.f32 0.0, %v559_v54  ;;  %v624_v26 = vstv %s1704_s3  ;;  %v628_v25 = vstv %s1706_s4  ;;  %s1807_s3 = sld [smem:[#allocation2 + $0x7f]]  ;;  %s996_s4 = sld [smem:[#allocation2 + $0x83]] }
  0xcb   : > { %1117 = vpow2.f32 %v586_v53  ;;  %v591_v32 = vmul.f32 1.442695, %v590_v16  ;;  %v635_v3 = vstv %s1708_s7  ;;  %v638_v13 = vstv %s1710_s8  ;;  %s1809_s7 = sld [smem:[#allocation2 + $0x82]]  ;;  %s1933_s8 = sld [smem:[#allocation15_spill]] }
  0xcc   : > { %v596_v56 = vmul.f32 1.442695, %v595_v55  ;;  %v642_v22 = vstv %s1712_s15  ;;  %v646_v27 = vstv %s1714_s14  ;;  %v650_v8 = vstv %s1716_s20  ;;  %s1934_s15 = sld [smem:[#allocation20_spill]]  ;;  %s997_s14 = sld [smem:[#allocation2 + $0x84]] }
  0xcd   : > { %1119 = vpow2.f32 %v591_v32  ;;  %v654_v40 = vstv %s1718_s23  ;;  %v658_v41 = vstv %s1720_s17  ;;  %v662_v43 = vstv %s1722_s22  ;;  %s1935_s20 = sld [smem:[#allocation19_spill]] }
  0xce   : > { %1121 = vpow2.f32 %v596_v56  ;;  %v669_v44 = vstv %s1724_s0  ;;  %v672_v45 = vstv %s1726_s1  ;;  %v676_v28 = vstv %s1728_s9 }
  0xcf   : > { %v680_v29 = vstv %s1730_s10  ;;  %v684_v46 = vstv %s1732_s11  ;;  %v688_v63 = vstv %s1734_s12  ;;  %v703_v47 = vstv %s1741_s5  ;;  %s1937_s10 = sld [smem:[#allocation30_spill]]  ;;  %s1256_s5 = smov [#allocation7]  }
  0xd0   : > { %v1108_v57 = vpop.eup %1107  ;;  %v692_v48 = vstv %s1736_s16  ;;  %v696_v17 = vstv %s1739_s18  ;;  %v706_v49 = vstv %s1745_s25  ;;  %v710_v7 = vstv %s1747_s26  ;;  %s1186_s25 = sshll.u32 %s1256_s5, 4  ;;  %s1187_s25 = int_to_ptr.vmem [resolvable:$false] %s1186_s25 }
  0xd1   : > { %v1110_v58 = vpop.eup %1109  ;;  %v563_v59 = vadd.f32 1.0, %v1108_v57  ;;  %v714_v33 = vstv %s1751_s27  ;;  %s999_s23 = sshll.u32 %s1933_s8, 7  ;;  %s1188_s26 = scalar_lea.vmem %s1187_s25, 256 }
  0xd2   : > { %v1112_v0 = vpop.eup %1111  ;;  %v568_v60 = vadd.f32 1.0, %v1110_v58  ;;  %s1936_s17 = sshll.u32 %s1934_s15, 3  ;;  %s761_s12 = scalar_lea.sflag [#allocation4], %s1934_s15 }
  0xd3   : > { %v1114_v1 = vpop.eup %1113  ;;  %1123 = vrcp.f32 %v563_v59  ;;  %v573_v4 = vadd.f32 1.0, %v1112_v0  ;;  %s170_s22 = scalar_lea.vmem [#allocation7], %s1936_s17  ;;  %p1939_p3 = scmp.ne.s32.totalorder %s1935_s20, 0 }
  0xd4   : > { %v1116_v61 = vpop.eup %1115  ;;  %1125 = vrcp.f32 %v568_v60  ;;  %v578_v2 = vadd.f32 1.0, %v1114_v1  ;;  %v718_v60 = vstv %s1764_s2  ;;  %s774_s0 = sshll.u32 %s170_s22, 4  ;;  %s1829_s0 = int_to_ptr.vmem [resolvable:$true] %s774_s0 }
  0xd5   : > { %v1118_v10 = vpop.eup %1117  ;;  %1127 = vrcp.f32 %v573_v4  ;;  %v583_v11 = vadd.f32 1.0, %v1116_v61  ;;  %s1938_s16 = smov %s1937_s10  ;;  %s1827_s11 = scalar_lea.hbm %s1937_s10, %s999_s23 }
  0xd6   : > { %1129 = vrcp.f32 %v578_v2  ;;  %v588_v5 = vadd.f32 1.0, %v1118_v10  ;;  %s1182_s18 = scalar_lea.vmem %s1829_s0, 128  ;;  %p1189_p1 = scmp.lt.s32.totalorder %s1829_s0, %s1187_s25 }
  0xd7   : > { %v1120_v20 = vpop.eup %1119  ;;  %1131 = vrcp.f32 %v583_v11  ;;  %p1183_p8 = scmp.ne.s32.totalorder %s1829_s0, %s1182_s18  ;;  %p1190_p2 = scmp.lt.s32.totalorder %s1188_s26, %s1182_s18 }
  0xd8   : > { %v1122_v62 = vpop.eup %1121  ;;  %1133 = vrcp.f32 %v588_v5  ;;  %v593_v39 = vadd.f32 1.0, %v1120_v20 }
  0xd9   : > { %v598_v14 = vadd.f32 1.0, %v1122_v62  ;;  %p1184_p10 = pnand %p1183_p8, %p1939_p3  ;;  %p1191_p11 = por %p1190_p2, %p1189_p1 }
  0xda   : > { %1135 = vrcp.f32 %v593_v39 }
  0xdb   : > { %1137 = vrcp.f32 %v598_v14  ;;  %v726_v14 = vstv %s1780_s6  ;;  %p1185_p5 = pneg %p1184_p10 }
  0xdd   : > { %v1124_v6 = vpop.eup %1123  ;;  %p1192_p13 = pnand %p1191_p11, %p1185_p5 }
  0xde   : > { %v1126_v50 = vpop.eup %1125  ;;  %v602_v30 = vmul.f32 %v1124_v6, %v601_v9  ;;  %v636_v24 = vmul.f32 %v1124_v6, %v635_v3  ;;  %v670_v31 = vmul.f32 %v1124_v6, %v669_v44  ;;  %v704_v38 = vmul.f32 %v1124_v6, %v703_v47 }
  0xdf   : > { %v1128_v34 = vpop.eup %1127  ;;  %v605_v35 = vmul.f32 %v1126_v50, %v604_v12  ;;  %v639_v36 = vmul.f32 %v1126_v50, %v638_v13  ;;  %v673_v23 = vmul.f32 %v1126_v50, %v672_v45  ;;  %v707_v53 = vmul.f32 %v1126_v50, %v706_v49 }
  0xe0   : > { %v1130_v42 = vpop.eup %1129  ;;  %v609_v51 = vmul.f32 %v1128_v34, %v608_v18  ;;  %v643_v37 = vmul.f32 %v1128_v34, %v642_v22  ;;  %v677_v52 = vmul.f32 %v1128_v34, %v676_v28  ;;  %v711_v0 = vmul.f32 %v1128_v34, %v710_v7 }
  0xe1   : > { %v1132_v54 = vpop.eup %1131  ;;  %v606_v16 = vadd.f32 %v605_v35, %v602_v30  ;;  %v613_v55 = vmul.f32 %v1130_v42, %v612_v19  ;;  %v640_v32 = vadd.f32 %v639_v36, %v636_v24  ;;  %v647_v56 = vmul.f32 %v1130_v42, %v646_v27 }
  0xe2   : > { %v1134_v57 = vpop.eup %1133  ;;  %v674_v58 = vadd.f32 %v673_v23, %v670_v31  ;;  %v681_v59 = vmul.f32 %v1130_v42, %v680_v29  ;;  %v617_v4 = vmul.f32 %v1132_v54, %v616_v15  ;;  %v651_v2 = vmul.f32 %v1132_v54, %v650_v8 }
  0xe3   : > { %v610_v1 = vadd.f32 %v609_v51, %v606_v16  ;;  %v644_v61 = vadd.f32 %v643_v37, %v640_v32  ;;  %v685_v11 = vmul.f32 %v1132_v54, %v684_v46  ;;  %v708_v12 = vadd.f32 %v707_v53, %v704_v38 }
  0xe4   : > { %v1136_v9 = vpop.eup %1135  ;;  %v678_v10 = vadd.f32 %v677_v52, %v674_v58  ;;  %v722_v18 = vstv %s1773_s13  ;;  %v621_v19 = vmul.f32 %v1134_v57, %v620_v21  ;;  %v655_v20 = vmul.f32 %v1134_v57, %v654_v40 }
  0xe5   : > { %v614_v5 = vadd.f32 %v613_v55, %v610_v1  ;;  %v648_v15 = vadd.f32 %v647_v56, %v644_v61  ;;  %v1138_v62 = vpop.eup %1137  ;;  %v625_v39 = vmul.f32 %v1136_v9, %v624_v26  ;;  %v689_v13 = vmul.f32 %v1134_v57, %v688_v63 }
  0xe6   : > { %v682_v3 = vadd.f32 %v681_v59, %v678_v10  ;;  %v659_v8 = vmul.f32 %v1136_v9, %v658_v41  ;;  %v712_v44 = vadd.f32 %v711_v0, %v708_v12  ;;  %v693_v21 = vmul.f32 %v1136_v9, %v692_v48 }
  0xe7   : > { %v618_v22 = vadd.f32 %v617_v4, %v614_v5  ;;  %v652_v27 = vadd.f32 %v651_v2, %v648_v15  ;;  %v715_v40 = vmul.f32 %v1130_v42, %v714_v33  ;;  %v719_v28 = vmul.f32 %v1132_v54, %v718_v60 }
  0xe8   : > { %v686_v45 = vadd.f32 %v685_v11, %v682_v3  ;;  %v629_v29 = vmul.f32 %v1138_v62, %v628_v25  ;;  %v663_v63 = vmul.f32 %v1138_v62, %v662_v43  ;;  %v697_v47 = vmul.f32 %v1138_v62, %v696_v17 }
  0xe9   : > { %v622_v26 = vadd.f32 %v621_v19, %v618_v22  ;;  %v656_v46 = vadd.f32 %v655_v20, %v652_v27  ;;  %v716_v6 = vadd.f32 %v715_v40, %v712_v44  ;;  %v723_v48 = vmul.f32 %v1134_v57, %v722_v18 }
  0xea   : > { %v690_v41 = vadd.f32 %v689_v13, %v686_v45  ;;  %v632_v7 = vstv %s1783_s21  ;;  %v730_v30 = vstv %s1785_s24  ;;  %v666_v24 = vstv %s1787_s28 }
  0xeb   : > { %v626_v49 = vadd.f32 %v625_v39, %v622_v26  ;;  %v660_v50 = vadd.f32 %v659_v8, %v656_v46  ;;  %v720_v43 = vadd.f32 %v719_v28, %v716_v6  ;;  %v727_v31 = vmul.f32 %v1136_v9, %v726_v14 }
  0xec   : > { %v694_v25 = vadd.f32 %v693_v21, %v690_v41  ;;  %v700_v35 = vstv %s1792_s29  ;;  %v731_v23 = vmul.f32 %v1138_v62, %v730_v30  ;;  %v741_v52 = vstv %s1799_s30 }
  0xed   : > { %v630_v33 = vadd.f32 %v629_v29, %v626_v49  ;;  %v664_v34 = vadd.f32 %v663_v63, %v660_v50  ;;  %v724_v17 = vadd.f32 %v723_v48, %v720_v43  ;;  %v744_v53 = vstv %s1801_s19 }
  0xee   : > { %v698_v36 = vadd.f32 %v697_v47, %v694_v25  ;;  %v734_v54 = vstv %s1807_s3  ;;  %v748_v32 = vstv %s1809_s7  ;;  %v752_v4 = vstv %s996_s4 }
  0xef   : > { %v633_v38 = vadd.f32 %v632_v7, %v630_v33  ;;  %v667_v42 = vadd.f32 %v666_v24, %v664_v34  ;;  %v728_v37 = vadd.f32 %v727_v31, %v724_v17  ;;  %v756_v10 = vstv %s997_s14 }
  0xf0   : > { %v701_v51 = vadd.f32 %v700_v35, %v698_v36 }
  0xf1   : > { %v736_v16 = vmax.f32 %v633_v38, 0.0  ;;  %v737_v55 = vmax.f32 %v667_v42, 0.0  ;;  %v732_v56 = vadd.f32 %v731_v23, %v728_v37 }
  0xf2   : > { %v738_v57 = vmax.f32 %v701_v51, 0.0 }
  0xf3   : > { %v742_v58 = vmul.f32 %v741_v52, %v736_v16  ;;  %v745_v59 = vmul.f32 %v744_v53, %v737_v55  ;;  %v735_v0 = vadd.f32 %v734_v54, %v732_v56 }
  0xf4   : > { %v749_v60 = vmul.f32 %v748_v32, %v738_v57 }
  0xf5   : > { %v746_v1 = vadd.f32 %v745_v59, %v742_v58  ;;  %v739_v61 = vmax.f32 %v735_v0, 0.0 }
  0xf7   : > { %v750_v2 = vadd.f32 %v749_v60, %v746_v1  ;;  %v753_v9 = vmul.f32 %v752_v4, %v739_v61 }
  0xf9   : > { %v754_v11 = vadd.f32 %v753_v9, %v750_v2 }
  0xfb   : > { %v757_v12 = vadd.f32 %v756_v10, %v754_v11 }
  0xfd   : > { %v758_v18 = vmax.f32 %v757_v12, 0.0 }
  0xff   : > { %759 = vst [vmem:[%s170_s22] sm:$0xff] %v758_v18 }
 0x100   : > { %1195 = shalt.err (!%p1192_p13)
}
 0x101   : > { %s1196_s27 = scalar_lea.hbm %s1827_s11, 128  ;;  %s1200_s6 = scalar_lea.hbm %s1938_s16, 384 }
 0x102   : > { %p1197_p0 = scmp.ne.s32.totalorder %s1827_s11, %s1196_s27  ;;  %p1201_p6 = scmp.lt.u32.totalorder %s1827_s11, %s1938_s16 }
 0x103   : > { %p1202_p12 = scmp.lt.u32.totalorder %s1200_s6, %s1196_s27  ;;  %p1204_p8 = scmp.lt.u32.totalorder %s1196_s27, %s1827_s11 }
 0x104   : > { %p1198_p7 = pnand %p1197_p0, %p1939_p3 }
 0x105   : > { %p1203_p4 = por %p1202_p12, %p1201_p6 }
 0x106   : > { %p1199_p9 = pneg %p1198_p7 }
 0x107   : > { %p1205_p10 = por %p1204_p8, %p1203_p4 }
 0x109   : > { %p1206_p5 = pnand %p1205_p10, %p1199_p9 }
 0x10b   : > { %1209 = shalt.err (!%p1206_p5)
}
 0x10c   : > { %1008 = dma.vmem_to_hbm [thread:$0]  (%p1939_p3), %s1829_s0, 128, %s1827_s11, %s761_s12  }
 0x10d PF: > { %s1940_s28 = sld [smem:[#allocation14_spill]]  ;;  %s1941_s29 = sld [smem:[#allocation11_spill]] }
 0x10e   : > { %s1942_s30 = sld [smem:[#allocation16_spill]] }
 0x113   : > { %p1025_p1 = scmp.ge.s32.totalorder %s1940_s28, 2  ;;  %s786_s19 = sand.u32 1, %s1941_s29  }
 0x114   : > { %p1943_p2 = scmp.ne.s32.totalorder %s1942_s30, 0  ;;  %s787_s3 = scalar_lea.sflag [#allocation4], %s786_s19 }
 0x116   : > { %p1019_p11 = pnand %p1025_p1, %p1943_p2 }
 0x118   : > { %1235 = dma.done.wait (!%p1019_p11), %s787_s3, 128  }
 0x119   : > { %1237 = vsyncadd (!%p1019_p11), %s787_s3, 4294967168  ;;  %s1944_s12 = sld [smem:[#allocation17_spill]]  ;;  %s1945_s9 = sld [smem:[#allocation12_spill]] }
 0x11a   : > { %s1946_s10 = sld [smem:[#allocation13_spill]]  ;;  %s1947_s11 = sld [smem:[#allocation18_spill]] }
 0x11f   : > { %p16_p13 = scmp.ge.s32.totalorder %s1944_s12, 5  }
 0x121   :  { %18 = sbr.rel (!%p16_p13) target bundleno = 10 (0xa), region = 78 }
 0x128   :  { %792 = vsyncpa [#allocation3], 1 }
 0x129   :  { %794 = vsyncpa [#allocation3 + $0x1], 1 }
 0x12a   :  { %795 = vsyncpa [#allocation4], 1 }
 0x12b   :  { %797 = vsyncpa [#allocation4 + $0x1], 1 }
 0x12c   :  { %798 = vsyncpa [#allocation5], 1 }
 0x12d   :  { %800 = vsyncpa [#allocation5 + $0x1], 1 }

</bundles_post_ra>
